<compile_context>
chip_gen: v6e
topology: v6e:2x2x1
jax: 0.10.0
libtpu: 0.0.40
codegen_flags: <defaults>
</compile_context>

<pallas_src>
import functools

import jax
import jax.numpy as jnp
import numpy as np
from jax.experimental import pallas as pl
from jax.experimental.pallas import tpu as pltpu


# ---------------------------------------------------------------------------
# Fused Pallas kernel (one grid step == one sample)
# ---------------------------------------------------------------------------
def _vgg_fused_kernel(x_ref, w1_ref, b1_ref, w2_ref, b2_ref, mask_ref,
                      r_ref, s_ref, g_ref, o_ref, *,
                      islayernorm, tap_offsets, lw, n_valid, n_out):
    cf = b1_ref.shape[0]          # conv1 out channels
    ce = b2_ref.shape[0]          # conv2 out channels
    x = x_ref[0]                  # [Cin_p, LF]  flat padded image (mxu dtype)

    # ---- conv1 (3x3, s1, p1): 9 tap matmuls, spatial (H*WQ lanes) lane-dense ----
    acc1 = jnp.zeros((cf, lw), jnp.float32)
    for t, off in enumerate(tap_offsets):
        acc1 = acc1 + jnp.dot(w1_ref[t], x[:, off:off + lw],
                              preferred_element_type=jnp.float32)
    y1 = jnp.maximum(acc1 + b1_ref[...], 0.0)          # bias + ReLU (f32 epilogue)

    # ---- LayerNorm over [C,H,W]; mask excludes the wide-layout pad columns ----
    if islayernorm:
        m = mask_ref[...]                               # [1, lw]
        s_row = jnp.sum(y1 * m, axis=1, keepdims=True)  # [cf, 1]
        mean = jnp.sum(s_row, axis=0, keepdims=True) / n_valid    # [1, 1]
        cen = (y1 - mean) * m
        v_row = jnp.sum(cen * cen, axis=1, keepdims=True)
        var = jnp.sum(v_row, axis=0, keepdims=True) / n_valid
        y1 = (y1 - mean) * jax.lax.rsqrt(var + 1e-5)

    # ---- relayout: wide layout -> zero-padded flat image for conv2 (matrix R
    #      also zeroes the wide-layout garbage columns) ----
    f2 = jnp.dot(y1, r_ref[...], preferred_element_type=jnp.float32)   # [cf, LF]
    f2 = f2.astype(w2_ref.dtype)

    # ---- conv2 (3x3, s2, p1): stride-1 wide conv, then 0/1 column-select S
    #      picks the stride-2 output grid (and drops pad columns) ----
    acc2 = jnp.zeros((ce, lw), jnp.float32)
    for t, off in enumerate(tap_offsets):
        acc2 = acc2 + jnp.dot(w2_ref[t], f2[:, off:off + lw],
                              preferred_element_type=jnp.float32)
    y2 = jnp.dot(acc2, s_ref[...], preferred_element_type=jnp.float32) # [ce, SelW]
    y2 = jnp.maximum(y2 + b2_ref[...], 0.0)

    # ---- F.normalize(p=2, dim=-1): per-(c, oh) sum of squares via block-diag G,
    #      x * rsqrt(max(ss, eps^2)) == x / max(||x||_2, eps), eps = 1e-12 ----
    ss = jnp.dot(y2 * y2, g_ref[...], preferred_element_type=jnp.float32)
    out = y2 * jax.lax.rsqrt(jnp.maximum(ss, 1e-24))
    o_ref[0] = out[:, :n_out].astype(o_ref.dtype)


# ---------------------------------------------------------------------------
# Trace-time constants for the flattened "wide" conv layout
# ---------------------------------------------------------------------------
def _build_constants(H, W, Ho, Wo):
    WQ = W + 8                                     # padded row pitch (8-aligned)
    LW = H * WQ                                    # wide stride-1 output length
    LF = ((2 * WQ + 2 + LW + 127) // 128) * 128    # flat padded-image length
    SelW = ((Ho * Wo + 127) // 128) * 128          # lane-padded selected width

    mask = np.zeros((1, LW), np.float32)           # 1 on valid columns
    for h in range(H):
        mask[0, h * WQ:h * WQ + W] = 1.0

    R = np.zeros((LW, LF), np.float32)             # wide -> zero-padded flat image
    for h in range(H):
        for w in range(W):
            R[h * WQ + w, (h + 1) * WQ + (w + 1)] = 1.0

    S = np.zeros((LW, SelW), np.float32)           # stride-2 column selection
    for oh in range(Ho):
        for ow in range(Wo):
            S[(2 * oh) * WQ + 2 * ow, oh * Wo + ow] = 1.0

    G = np.zeros((SelW, SelW), np.float32)         # per-(c, oh) group sum over W
    for oh in range(Ho):
        for a in range(Wo):
            for b in range(Wo):
                G[oh * Wo + a, oh * Wo + b] = 1.0
    return WQ, LW, LF, SelW, mask, R, S, G


# ---------------------------------------------------------------------------
# VggConvAuto.forward
# ---------------------------------------------------------------------------
@functools.partial(jax.jit, static_argnames=("islayernorm", "mxu_dtype"))
def vgg_conv_auto_forward(x, params, islayernorm=True, mxu_dtype=jnp.float32):
    B, Cin, H, W = x.shape
    Cf, _, K, _ = params["base_w"].shape
    Ce = params["enc_w"].shape[0]
    Ho, Wo = H // 2, W // 2
    Cin_p = max(8, ((Cin + 7) // 8) * 8)           # pad input channels to >= 8

    WQ, LW, LF, SelW, mask, R, S, G = _build_constants(H, W, Ho, Wo)
    tap_offsets = tuple(di * WQ + dj for di in range(K) for dj in range(K))

    # Zero-padded, row-flattened input image (pad 1 top/left, >=1 bottom/right).
    xp = jnp.pad(x, ((0, 0), (0, Cin_p - Cin), (1, 1), (1, WQ - W - 1)))
    xflat = xp.reshape(B, Cin_p, (H + 2) * WQ)
    xflat = jnp.pad(xflat, ((0, 0), (0, 0), (0, LF - (H + 2) * WQ)))
    xflat = xflat.astype(mxu_dtype)

    # Per-tap weights [K*K, Cout, Cin] so tap t is a plain leading-dim load.
    w1 = jnp.pad(params["base_w"], ((0, 0), (0, Cin_p - Cin), (0, 0), (0, 0)))
    w1t = w1.transpose(2, 3, 0, 1).reshape(K * K, Cf, Cin_p).astype(mxu_dtype)
    b1 = params["base_b"].reshape(Cf, 1).astype(jnp.float32)
    w2t = params["enc_w"].transpose(2, 3, 0, 1).reshape(K * K, Ce, Cf).astype(mxu_dtype)
    b2 = params["enc_b"].reshape(Ce, 1).astype(jnp.float32)

    kernel = functools.partial(
        _vgg_fused_kernel, islayernorm=islayernorm, tap_offsets=tap_offsets,
        lw=LW, n_valid=float(Cf * H * W), n_out=Ho * Wo)

    out = pl.pallas_call(
        kernel,
        out_shape=jax.ShapeDtypeStruct((B, Ce, Ho * Wo), jnp.float32),
        grid=(B,),
        in_specs=[
            pl.BlockSpec((1, Cin_p, LF), lambda b: (b, 0, 0)),       # input image
            pl.BlockSpec((K * K, Cf, Cin_p), lambda b: (0, 0, 0)),   # conv1 taps
            pl.BlockSpec((Cf, 1), lambda b: (0, 0)),                 # conv1 bias
            pl.BlockSpec((K * K, Ce, Cf), lambda b: (0, 0, 0)),      # conv2 taps
            pl.BlockSpec((Ce, 1), lambda b: (0, 0)),                 # conv2 bias
            pl.BlockSpec((1, LW), lambda b: (0, 0)),                 # valid-col mask
            pl.BlockSpec((LW, LF), lambda b: (0, 0)),                # R: re-pad
            pl.BlockSpec((LW, SelW), lambda b: (0, 0)),              # S: stride-2 sel
            pl.BlockSpec((SelW, SelW), lambda b: (0, 0)),            # G: L2 group sum
        ],
        out_specs=pl.BlockSpec((1, Ce, Ho * Wo), lambda b: (b, 0, 0)),
        compiler_params=pltpu.CompilerParams(
            dimension_semantics=("parallel",)),
    )(xflat, w1t, b1, w2t, b2,
      jnp.asarray(mask), jnp.asarray(R), jnp.asarray(S), jnp.asarray(G))

    return out.reshape(B, Ce, Ho, Wo)


# ---------------------------------------------------------------------------
# Pure-JAX reference (correctness sanity check)
# ---------------------------------------------------------------------------
def _ref_conv_relu(x, w, b, stride, pad):
    y = jax.lax.conv_general_dilated(
        x, w, (stride, stride), [(pad, pad), (pad, pad)],
        dimension_numbers=("NCHW", "OIHW", "NCHW"),
        precision=jax.lax.Precision.HIGHEST)
    return jnp.maximum(y + b[None, :, None, None], 0.0)


def _ref_forward(x, params, islayernorm=True):
    f = _ref_conv_relu(x, params["base_w"], params["base_b"], 1, 1)
    if islayernorm:
        mean = f.mean(axis=(1, 2, 3), keepdims=True)
        var = ((f - mean) ** 2).mean(axis=(1, 2, 3), keepdims=True)
        f = (f - mean) / jnp.sqrt(var + 1e-5)
    e = _ref_conv_relu(f, params["enc_w"], params["enc_b"], 2, 1)
    nrm = jnp.sqrt(jnp.sum(e * e, axis=-1, keepdims=True))
    return e / jnp.maximum(nrm, 1e-12)


if __name__ == "__main__":
    key = jax.random.PRNGKey(0)
    kx, k1, k2, k3, k4 = jax.random.split(key, 5)

    B, C_IN, H, W = 2, 4, 16, 16
    C_FEAT, C_ENC, K = 8, 16, 3

    x = jax.random.normal(kx, (B, C_IN, H, W), dtype=jnp.float32)
    params = {
        "base_w": 0.2 * jax.random.normal(k1, (C_FEAT, C_IN, K, K), jnp.float32),
        "base_b": 0.1 * jax.random.normal(k2, (C_FEAT,), jnp.float32),
        "enc_w": 0.2 * jax.random.normal(k3, (C_ENC, C_FEAT, K, K), jnp.float32),
        "enc_b": 0.1 * jax.random.normal(k4, (C_ENC,), jnp.float32),
    }

    ref = jax.block_until_ready(_ref_forward(x, params, islayernorm=True))

    # f32 MXU-operand path: faithful to the PyTorch f32 module, checked tightly.
    out = vgg_conv_auto_forward(x, params, islayernorm=True,
                                mxu_dtype=jnp.float32)
    out = jax.block_until_ready(out)
    assert out.shape == (B, C_ENC, H // 2, W // 2), out.shape
    np.testing.assert_allclose(np.asarray(out), np.asarray(ref),
                               rtol=2e-2, atol=2e-2)

    # bf16 MXU-operand path (f32 accumulate / epilogues), the perf knob from the
    # review.  Elementwise comparison vs the f32 reference is ill-conditioned at
    # ReLU zero-crossings of near-zero rows, so check a global error bound only.
    out_bf16 = vgg_conv_auto_forward(x, params, islayernorm=True,
                                     mxu_dtype=jnp.bfloat16)
    out_bf16 = jax.block_until_ready(out_bf16)
    assert out_bf16.shape == ref.shape
    assert bool(jnp.all(jnp.isfinite(out_bf16)))
    rel = float(jnp.linalg.norm(out_bf16 - ref) / jnp.linalg.norm(ref))
    assert rel < 0.25, f"bf16 path relative error too large: {rel}"

    print("KERNEL_OK")
</pallas_src>

<mosaic_0001>
module attributes {stable_mosaic.version = 11 : i64} {
  func.func @_vgg_fused_kernel(%arg0: i32, %arg1: memref<1x8x512xf32, #tpu.memory_space<vmem>>, %arg2: memref<9x8x8xf32, #tpu.memory_space<vmem>>, %arg3: memref<8x1xf32, #tpu.memory_space<vmem>>, %arg4: memref<9x16x8xf32, #tpu.memory_space<vmem>>, %arg5: memref<16x1xf32, #tpu.memory_space<vmem>>, %arg6: memref<1x384xf32, #tpu.memory_space<vmem>>, %arg7: memref<384x512xf32, #tpu.memory_space<vmem>>, %arg8: memref<384x128xf32, #tpu.memory_space<vmem>>, %arg9: memref<128x128xf32, #tpu.memory_space<vmem>>, %arg10: memref<1x16x64xf32, #tpu.memory_space<vmem>>) attributes {dimension_semantics = [#tpu.dimension_semantics<parallel>], iteration_bounds = array<i64: 2>, scalar_prefetch = 0 : i64, scratch_operands = 0 : i64, tpu.core_type = #tpu.core_type<tc>, window_params = [{transform_indices = @transform_0, window_bounds = array<i64: 1, 8, 512>}, {pipeline_mode = #tpu.pipeline_mode<synchronous>, transform_indices = @transform_1, window_bounds = array<i64: 9, 8, 8>}, {pipeline_mode = #tpu.pipeline_mode<synchronous>, transform_indices = @transform_2, window_bounds = array<i64: 8, 1>}, {pipeline_mode = #tpu.pipeline_mode<synchronous>, transform_indices = @transform_3, window_bounds = array<i64: 9, 16, 8>}, {pipeline_mode = #tpu.pipeline_mode<synchronous>, transform_indices = @transform_4, window_bounds = array<i64: 16, 1>}, {pipeline_mode = #tpu.pipeline_mode<synchronous>, transform_indices = @transform_5, window_bounds = array<i64: 1, 384>}, {pipeline_mode = #tpu.pipeline_mode<synchronous>, transform_indices = @transform_6, window_bounds = array<i64: 384, 512>}, {pipeline_mode = #tpu.pipeline_mode<synchronous>, transform_indices = @transform_7, window_bounds = array<i64: 384, 128>}, {pipeline_mode = #tpu.pipeline_mode<synchronous>, transform_indices = @transform_8, window_bounds = array<i64: 128, 128>}, {transform_indices = @transform_9, window_bounds = array<i64: 1, 16, 64>}]} {
    %c0 = arith.constant 0 : index
    %c0_0 = arith.constant 0 : index
    %c0_1 = arith.constant 0 : index
    %0 = vector.load %arg1[%c0, %c0_0, %c0_1] : memref<1x8x512xf32, #tpu.memory_space<vmem>>, vector<1x8x512xf32>
    %1 = vector.shape_cast %0 : vector<1x8x512xf32> to vector<8x512xf32>
    %cst = arith.constant 0.000000e+00 : f32
    %2 = vector.broadcast %cst : f32 to vector<8x384xf32>
    %c0_2 = arith.constant 0 : index
    %c0_3 = arith.constant 0 : index
    %c0_4 = arith.constant 0 : index
    %3 = vector.load %arg2[%c0_2, %c0_3, %c0_4] : memref<9x8x8xf32, #tpu.memory_space<vmem>>, vector<1x8x8xf32>
    %4 = vector.shape_cast %3 : vector<1x8x8xf32> to vector<8x8xf32>
    %5 = vector.extract_strided_slice %1 {offsets = [0, 0], sizes = [8, 384], strides = [1, 1]} : vector<8x512xf32> to vector<8x384xf32>
    %cst_5 = arith.constant dense<0.000000e+00> : vector<8x384xf32>
    %6 = tpu.matmul %4, %5, %cst_5 {dimension_numbers = #tpu.dot_dimension_numbers<[1], [0], [0], [1], [0, 0, 1, 1], [], []>} : vector<8x8xf32>, vector<8x384xf32>, vector<8x384xf32> -> vector<8x384xf32>
    %7 = arith.addf %2, %6 : vector<8x384xf32>
    %c1 = arith.constant 1 : index
    %c0_6 = arith.constant 0 : index
    %c0_7 = arith.constant 0 : index
    %8 = vector.load %arg2[%c1, %c0_6, %c0_7] : memref<9x8x8xf32, #tpu.memory_space<vmem>>, vector<1x8x8xf32>
    %9 = vector.shape_cast %8 : vector<1x8x8xf32> to vector<8x8xf32>
    %10 = vector.extract_strided_slice %1 {offsets = [0, 1], sizes = [8, 384], strides = [1, 1]} : vector<8x512xf32> to vector<8x384xf32>
    %cst_8 = arith.constant dense<0.000000e+00> : vector<8x384xf32>
    %11 = tpu.matmul %9, %10, %cst_8 {dimension_numbers = #tpu.dot_dimension_numbers<[1], [0], [0], [1], [0, 0, 1, 1], [], []>} : vector<8x8xf32>, vector<8x384xf32>, vector<8x384xf32> -> vector<8x384xf32>
    %12 = arith.addf %7, %11 : vector<8x384xf32>
    %c2 = arith.constant 2 : index
    %c0_9 = arith.constant 0 : index
    %c0_10 = arith.constant 0 : index
    %13 = vector.load %arg2[%c2, %c0_9, %c0_10] : memref<9x8x8xf32, #tpu.memory_space<vmem>>, vector<1x8x8xf32>
    %14 = vector.shape_cast %13 : vector<1x8x8xf32> to vector<8x8xf32>
    %15 = vector.extract_strided_slice %1 {offsets = [0, 2], sizes = [8, 384], strides = [1, 1]} : vector<8x512xf32> to vector<8x384xf32>
    %cst_11 = arith.constant dense<0.000000e+00> : vector<8x384xf32>
    %16 = tpu.matmul %14, %15, %cst_11 {dimension_numbers = #tpu.dot_dimension_numbers<[1], [0], [0], [1], [0, 0, 1, 1], [], []>} : vector<8x8xf32>, vector<8x384xf32>, vector<8x384xf32> -> vector<8x384xf32>
    %17 = arith.addf %12, %16 : vector<8x384xf32>
    %c3 = arith.constant 3 : index
    %c0_12 = arith.constant 0 : index
    %c0_13 = arith.constant 0 : index
    %18 = vector.load %arg2[%c3, %c0_12, %c0_13] : memref<9x8x8xf32, #tpu.memory_space<vmem>>, vector<1x8x8xf32>
    %19 = vector.shape_cast %18 : vector<1x8x8xf32> to vector<8x8xf32>
    %20 = vector.extract_strided_slice %1 {offsets = [0, 24], sizes = [8, 384], strides = [1, 1]} : vector<8x512xf32> to vector<8x384xf32>
    %cst_14 = arith.constant dense<0.000000e+00> : vector<8x384xf32>
    %21 = tpu.matmul %19, %20, %cst_14 {dimension_numbers = #tpu.dot_dimension_numbers<[1], [0], [0], [1], [0, 0, 1, 1], [], []>} : vector<8x8xf32>, vector<8x384xf32>, vector<8x384xf32> -> vector<8x384xf32>
    %22 = arith.addf %17, %21 : vector<8x384xf32>
    %c4 = arith.constant 4 : index
    %c0_15 = arith.constant 0 : index
    %c0_16 = arith.constant 0 : index
    %23 = vector.load %arg2[%c4, %c0_15, %c0_16] : memref<9x8x8xf32, #tpu.memory_space<vmem>>, vector<1x8x8xf32>
    %24 = vector.shape_cast %23 : vector<1x8x8xf32> to vector<8x8xf32>
    %25 = vector.extract_strided_slice %1 {offsets = [0, 25], sizes = [8, 384], strides = [1, 1]} : vector<8x512xf32> to vector<8x384xf32>
    %cst_17 = arith.constant dense<0.000000e+00> : vector<8x384xf32>
    %26 = tpu.matmul %24, %25, %cst_17 {dimension_numbers = #tpu.dot_dimension_numbers<[1], [0], [0], [1], [0, 0, 1, 1], [], []>} : vector<8x8xf32>, vector<8x384xf32>, vector<8x384xf32> -> vector<8x384xf32>
    %27 = arith.addf %22, %26 : vector<8x384xf32>
    %c5 = arith.constant 5 : index
    %c0_18 = arith.constant 0 : index
    %c0_19 = arith.constant 0 : index
    %28 = vector.load %arg2[%c5, %c0_18, %c0_19] : memref<9x8x8xf32, #tpu.memory_space<vmem>>, vector<1x8x8xf32>
    %29 = vector.shape_cast %28 : vector<1x8x8xf32> to vector<8x8xf32>
    %30 = vector.extract_strided_slice %1 {offsets = [0, 26], sizes = [8, 384], strides = [1, 1]} : vector<8x512xf32> to vector<8x384xf32>
    %cst_20 = arith.constant dense<0.000000e+00> : vector<8x384xf32>
    %31 = tpu.matmul %29, %30, %cst_20 {dimension_numbers = #tpu.dot_dimension_numbers<[1], [0], [0], [1], [0, 0, 1, 1], [], []>} : vector<8x8xf32>, vector<8x384xf32>, vector<8x384xf32> -> vector<8x384xf32>
    %32 = arith.addf %27, %31 : vector<8x384xf32>
    %c6 = arith.constant 6 : index
    %c0_21 = arith.constant 0 : index
    %c0_22 = arith.constant 0 : index
    %33 = vector.load %arg2[%c6, %c0_21, %c0_22] : memref<9x8x8xf32, #tpu.memory_space<vmem>>, vector<1x8x8xf32>
    %34 = vector.shape_cast %33 : vector<1x8x8xf32> to vector<8x8xf32>
    %35 = vector.extract_strided_slice %1 {offsets = [0, 48], sizes = [8, 384], strides = [1, 1]} : vector<8x512xf32> to vector<8x384xf32>
    %cst_23 = arith.constant dense<0.000000e+00> : vector<8x384xf32>
    %36 = tpu.matmul %34, %35, %cst_23 {dimension_numbers = #tpu.dot_dimension_numbers<[1], [0], [0], [1], [0, 0, 1, 1], [], []>} : vector<8x8xf32>, vector<8x384xf32>, vector<8x384xf32> -> vector<8x384xf32>
    %37 = arith.addf %32, %36 : vector<8x384xf32>
    %c7 = arith.constant 7 : index
    %c0_24 = arith.constant 0 : index
    %c0_25 = arith.constant 0 : index
    %38 = vector.load %arg2[%c7, %c0_24, %c0_25] : memref<9x8x8xf32, #tpu.memory_space<vmem>>, vector<1x8x8xf32>
    %39 = vector.shape_cast %38 : vector<1x8x8xf32> to vector<8x8xf32>
    %40 = vector.extract_strided_slice %1 {offsets = [0, 49], sizes = [8, 384], strides = [1, 1]} : vector<8x512xf32> to vector<8x384xf32>
    %cst_26 = arith.constant dense<0.000000e+00> : vector<8x384xf32>
    %41 = tpu.matmul %39, %40, %cst_26 {dimension_numbers = #tpu.dot_dimension_numbers<[1], [0], [0], [1], [0, 0, 1, 1], [], []>} : vector<8x8xf32>, vector<8x384xf32>, vector<8x384xf32> -> vector<8x384xf32>
    %42 = arith.addf %37, %41 : vector<8x384xf32>
    %c8 = arith.constant 8 : index
    %c0_27 = arith.constant 0 : index
    %c0_28 = arith.constant 0 : index
    %43 = vector.load %arg2[%c8, %c0_27, %c0_28] : memref<9x8x8xf32, #tpu.memory_space<vmem>>, vector<1x8x8xf32>
    %44 = vector.shape_cast %43 : vector<1x8x8xf32> to vector<8x8xf32>
    %45 = vector.extract_strided_slice %1 {offsets = [0, 50], sizes = [8, 384], strides = [1, 1]} : vector<8x512xf32> to vector<8x384xf32>
    %cst_29 = arith.constant dense<0.000000e+00> : vector<8x384xf32>
    %46 = tpu.matmul %44, %45, %cst_29 {dimension_numbers = #tpu.dot_dimension_numbers<[1], [0], [0], [1], [0, 0, 1, 1], [], []>} : vector<8x8xf32>, vector<8x384xf32>, vector<8x384xf32> -> vector<8x384xf32>
    %47 = arith.addf %42, %46 : vector<8x384xf32>
    %c0_30 = arith.constant 0 : index
    %c0_31 = arith.constant 0 : index
    %48 = vector.load %arg3[%c0_30, %c0_31] : memref<8x1xf32, #tpu.memory_space<vmem>>, vector<8x1xf32>
    %49 = vector.broadcast %48 : vector<8x1xf32> to vector<8x384xf32>
    %50 = arith.addf %47, %49 : vector<8x384xf32>
    %cst_32 = arith.constant 0.000000e+00 : f32
    %51 = vector.broadcast %cst_32 : f32 to vector<8x384xf32>
    %52 = arith.maximumf %50, %51 : vector<8x384xf32>
    %c0_33 = arith.constant 0 : index
    %c0_34 = arith.constant 0 : index
    %53 = vector.load %arg6[%c0_33, %c0_34] : memref<1x384xf32, #tpu.memory_space<vmem>>, vector<1x384xf32>
    %54 = vector.broadcast %53 : vector<1x384xf32> to vector<8x384xf32>
    %55 = arith.mulf %52, %54 : vector<8x384xf32>
    %cst_35 = arith.constant dense<0.000000e+00> : vector<8xf32>
    %56 = vector.multi_reduction <add>, %55, %cst_35 [1] : vector<8x384xf32> to vector<8xf32>
    %57 = vector.shape_cast %56 : vector<8xf32> to vector<8x1xf32>
    %cst_36 = arith.constant dense<0.000000e+00> : vector<1xf32>
    %58 = vector.multi_reduction <add>, %57, %cst_36 [0] : vector<8x1xf32> to vector<1xf32>
    %59 = vector.shape_cast %58 : vector<1xf32> to vector<1x1xf32>
    %cst_37 = arith.constant 2.048000e+03 : f32
    %60 = vector.broadcast %cst_37 : f32 to vector<1x1xf32>
    %61 = arith.divf %59, %60 : vector<1x1xf32>
    %62 = vector.broadcast %61 : vector<1x1xf32> to vector<8x384xf32>
    %63 = arith.subf %52, %62 : vector<8x384xf32>
    %64 = vector.broadcast %53 : vector<1x384xf32> to vector<8x384xf32>
    %65 = arith.mulf %63, %64 : vector<8x384xf32>
    %66 = arith.mulf %65, %65 : vector<8x384xf32>
    %cst_38 = arith.constant dense<0.000000e+00> : vector<8xf32>
    %67 = vector.multi_reduction <add>, %66, %cst_38 [1] : vector<8x384xf32> to vector<8xf32>
    %68 = vector.shape_cast %67 : vector<8xf32> to vector<8x1xf32>
    %cst_39 = arith.constant dense<0.000000e+00> : vector<1xf32>
    %69 = vector.multi_reduction <add>, %68, %cst_39 [0] : vector<8x1xf32> to vector<1xf32>
    %70 = vector.shape_cast %69 : vector<1xf32> to vector<1x1xf32>
    %cst_40 = arith.constant 2.048000e+03 : f32
    %71 = vector.broadcast %cst_40 : f32 to vector<1x1xf32>
    %72 = arith.divf %70, %71 : vector<1x1xf32>
    %73 = vector.broadcast %61 : vector<1x1xf32> to vector<8x384xf32>
    %74 = arith.subf %52, %73 : vector<8x384xf32>
    %cst_41 = arith.constant 9.99999974E-6 : f32
    %75 = vector.broadcast %cst_41 : f32 to vector<1x1xf32>
    %76 = arith.addf %72, %75 : vector<1x1xf32>
    %77 = math.rsqrt %76 : vector<1x1xf32>
    %78 = vector.broadcast %77 : vector<1x1xf32> to vector<8x384xf32>
    %79 = arith.mulf %74, %78 : vector<8x384xf32>
    %c0_42 = arith.constant 0 : index
    %c0_43 = arith.constant 0 : index
    %80 = vector.load %arg7[%c0_42, %c0_43] : memref<384x512xf32, #tpu.memory_space<vmem>>, vector<384x512xf32>
    %cst_44 = arith.constant dense<0.000000e+00> : vector<8x512xf32>
    %81 = tpu.matmul %79, %80, %cst_44 {dimension_numbers = #tpu.dot_dimension_numbers<[1], [0], [0], [1], [0, 0, 1, 1], [], []>} : vector<8x384xf32>, vector<384x512xf32>, vector<8x512xf32> -> vector<8x512xf32>
    %cst_45 = arith.constant 0.000000e+00 : f32
    %82 = vector.broadcast %cst_45 : f32 to vector<16x384xf32>
    %c0_46 = arith.constant 0 : index
    %c0_47 = arith.constant 0 : index
    %c0_48 = arith.constant 0 : index
    %83 = vector.load %arg4[%c0_46, %c0_47, %c0_48] : memref<9x16x8xf32, #tpu.memory_space<vmem>>, vector<1x16x8xf32>
    %84 = vector.shape_cast %83 : vector<1x16x8xf32> to vector<16x8xf32>
    %85 = vector.extract_strided_slice %81 {offsets = [0, 0], sizes = [8, 384], strides = [1, 1]} : vector<8x512xf32> to vector<8x384xf32>
    %cst_49 = arith.constant dense<0.000000e+00> : vector<16x384xf32>
    %86 = tpu.matmul %84, %85, %cst_49 {dimension_numbers = #tpu.dot_dimension_numbers<[1], [0], [0], [1], [0, 0, 1, 1], [], []>} : vector<16x8xf32>, vector<8x384xf32>, vector<16x384xf32> -> vector<16x384xf32>
    %87 = arith.addf %82, %86 : vector<16x384xf32>
    %c1_50 = arith.constant 1 : index
    %c0_51 = arith.constant 0 : index
    %c0_52 = arith.constant 0 : index
    %88 = vector.load %arg4[%c1_50, %c0_51, %c0_52] : memref<9x16x8xf32, #tpu.memory_space<vmem>>, vector<1x16x8xf32>
    %89 = vector.shape_cast %88 : vector<1x16x8xf32> to vector<16x8xf32>
    %90 = vector.extract_strided_slice %81 {offsets = [0, 1], sizes = [8, 384], strides = [1, 1]} : vector<8x512xf32> to vector<8x384xf32>
    %cst_53 = arith.constant dense<0.000000e+00> : vector<16x384xf32>
    %91 = tpu.matmul %89, %90, %cst_53 {dimension_numbers = #tpu.dot_dimension_numbers<[1], [0], [0], [1], [0, 0, 1, 1], [], []>} : vector<16x8xf32>, vector<8x384xf32>, vector<16x384xf32> -> vector<16x384xf32>
    %92 = arith.addf %87, %91 : vector<16x384xf32>
    %c2_54 = arith.constant 2 : index
    %c0_55 = arith.constant 0 : index
    %c0_56 = arith.constant 0 : index
    %93 = vector.load %arg4[%c2_54, %c0_55, %c0_56] : memref<9x16x8xf32, #tpu.memory_space<vmem>>, vector<1x16x8xf32>
    %94 = vector.shape_cast %93 : vector<1x16x8xf32> to vector<16x8xf32>
    %95 = vector.extract_strided_slice %81 {offsets = [0, 2], sizes = [8, 384], strides = [1, 1]} : vector<8x512xf32> to vector<8x384xf32>
    %cst_57 = arith.constant dense<0.000000e+00> : vector<16x384xf32>
    %96 = tpu.matmul %94, %95, %cst_57 {dimension_numbers = #tpu.dot_dimension_numbers<[1], [0], [0], [1], [0, 0, 1, 1], [], []>} : vector<16x8xf32>, vector<8x384xf32>, vector<16x384xf32> -> vector<16x384xf32>
    %97 = arith.addf %92, %96 : vector<16x384xf32>
    %c3_58 = arith.constant 3 : index
    %c0_59 = arith.constant 0 : index
    %c0_60 = arith.constant 0 : index
    %98 = vector.load %arg4[%c3_58, %c0_59, %c0_60] : memref<9x16x8xf32, #tpu.memory_space<vmem>>, vector<1x16x8xf32>
    %99 = vector.shape_cast %98 : vector<1x16x8xf32> to vector<16x8xf32>
    %100 = vector.extract_strided_slice %81 {offsets = [0, 24], sizes = [8, 384], strides = [1, 1]} : vector<8x512xf32> to vector<8x384xf32>
    %cst_61 = arith.constant dense<0.000000e+00> : vector<16x384xf32>
    %101 = tpu.matmul %99, %100, %cst_61 {dimension_numbers = #tpu.dot_dimension_numbers<[1], [0], [0], [1], [0, 0, 1, 1], [], []>} : vector<16x8xf32>, vector<8x384xf32>, vector<16x384xf32> -> vector<16x384xf32>
    %102 = arith.addf %97, %101 : vector<16x384xf32>
    %c4_62 = arith.constant 4 : index
    %c0_63 = arith.constant 0 : index
    %c0_64 = arith.constant 0 : index
    %103 = vector.load %arg4[%c4_62, %c0_63, %c0_64] : memref<9x16x8xf32, #tpu.memory_space<vmem>>, vector<1x16x8xf32>
    %104 = vector.shape_cast %103 : vector<1x16x8xf32> to vector<16x8xf32>
    %105 = vector.extract_strided_slice %81 {offsets = [0, 25], sizes = [8, 384], strides = [1, 1]} : vector<8x512xf32> to vector<8x384xf32>
    %cst_65 = arith.constant dense<0.000000e+00> : vector<16x384xf32>
    %106 = tpu.matmul %104, %105, %cst_65 {dimension_numbers = #tpu.dot_dimension_numbers<[1], [0], [0], [1], [0, 0, 1, 1], [], []>} : vector<16x8xf32>, vector<8x384xf32>, vector<16x384xf32> -> vector<16x384xf32>
    %107 = arith.addf %102, %106 : vector<16x384xf32>
    %c5_66 = arith.constant 5 : index
    %c0_67 = arith.constant 0 : index
    %c0_68 = arith.constant 0 : index
    %108 = vector.load %arg4[%c5_66, %c0_67, %c0_68] : memref<9x16x8xf32, #tpu.memory_space<vmem>>, vector<1x16x8xf32>
    %109 = vector.shape_cast %108 : vector<1x16x8xf32> to vector<16x8xf32>
    %110 = vector.extract_strided_slice %81 {offsets = [0, 26], sizes = [8, 384], strides = [1, 1]} : vector<8x512xf32> to vector<8x384xf32>
    %cst_69 = arith.constant dense<0.000000e+00> : vector<16x384xf32>
    %111 = tpu.matmul %109, %110, %cst_69 {dimension_numbers = #tpu.dot_dimension_numbers<[1], [0], [0], [1], [0, 0, 1, 1], [], []>} : vector<16x8xf32>, vector<8x384xf32>, vector<16x384xf32> -> vector<16x384xf32>
    %112 = arith.addf %107, %111 : vector<16x384xf32>
    %c6_70 = arith.constant 6 : index
    %c0_71 = arith.constant 0 : index
    %c0_72 = arith.constant 0 : index
    %113 = vector.load %arg4[%c6_70, %c0_71, %c0_72] : memref<9x16x8xf32, #tpu.memory_space<vmem>>, vector<1x16x8xf32>
    %114 = vector.shape_cast %113 : vector<1x16x8xf32> to vector<16x8xf32>
    %115 = vector.extract_strided_slice %81 {offsets = [0, 48], sizes = [8, 384], strides = [1, 1]} : vector<8x512xf32> to vector<8x384xf32>
    %cst_73 = arith.constant dense<0.000000e+00> : vector<16x384xf32>
    %116 = tpu.matmul %114, %115, %cst_73 {dimension_numbers = #tpu.dot_dimension_numbers<[1], [0], [0], [1], [0, 0, 1, 1], [], []>} : vector<16x8xf32>, vector<8x384xf32>, vector<16x384xf32> -> vector<16x384xf32>
    %117 = arith.addf %112, %116 : vector<16x384xf32>
    %c7_74 = arith.constant 7 : index
    %c0_75 = arith.constant 0 : index
    %c0_76 = arith.constant 0 : index
    %118 = vector.load %arg4[%c7_74, %c0_75, %c0_76] : memref<9x16x8xf32, #tpu.memory_space<vmem>>, vector<1x16x8xf32>
    %119 = vector.shape_cast %118 : vector<1x16x8xf32> to vector<16x8xf32>
    %120 = vector.extract_strided_slice %81 {offsets = [0, 49], sizes = [8, 384], strides = [1, 1]} : vector<8x512xf32> to vector<8x384xf32>
    %cst_77 = arith.constant dense<0.000000e+00> : vector<16x384xf32>
    %121 = tpu.matmul %119, %120, %cst_77 {dimension_numbers = #tpu.dot_dimension_numbers<[1], [0], [0], [1], [0, 0, 1, 1], [], []>} : vector<16x8xf32>, vector<8x384xf32>, vector<16x384xf32> -> vector<16x384xf32>
    %122 = arith.addf %117, %121 : vector<16x384xf32>
    %c8_78 = arith.constant 8 : index
    %c0_79 = arith.constant 0 : index
    %c0_80 = arith.constant 0 : index
    %123 = vector.load %arg4[%c8_78, %c0_79, %c0_80] : memref<9x16x8xf32, #tpu.memory_space<vmem>>, vector<1x16x8xf32>
    %124 = vector.shape_cast %123 : vector<1x16x8xf32> to vector<16x8xf32>
    %125 = vector.extract_strided_slice %81 {offsets = [0, 50], sizes = [8, 384], strides = [1, 1]} : vector<8x512xf32> to vector<8x384xf32>
    %cst_81 = arith.constant dense<0.000000e+00> : vector<16x384xf32>
    %126 = tpu.matmul %124, %125, %cst_81 {dimension_numbers = #tpu.dot_dimension_numbers<[1], [0], [0], [1], [0, 0, 1, 1], [], []>} : vector<16x8xf32>, vector<8x384xf32>, vector<16x384xf32> -> vector<16x384xf32>
    %127 = arith.addf %122, %126 : vector<16x384xf32>
    %c0_82 = arith.constant 0 : index
    %c0_83 = arith.constant 0 : index
    %128 = vector.load %arg8[%c0_82, %c0_83] : memref<384x128xf32, #tpu.memory_space<vmem>>, vector<384x128xf32>
    %cst_84 = arith.constant dense<0.000000e+00> : vector<16x128xf32>
    %129 = tpu.matmul %127, %128, %cst_84 {dimension_numbers = #tpu.dot_dimension_numbers<[1], [0], [0], [1], [0, 0, 1, 1], [], []>} : vector<16x384xf32>, vector<384x128xf32>, vector<16x128xf32> -> vector<16x128xf32>
    %c0_85 = arith.constant 0 : index
    %c0_86 = arith.constant 0 : index
    %130 = vector.load %arg5[%c0_85, %c0_86] : memref<16x1xf32, #tpu.memory_space<vmem>>, vector<16x1xf32>
    %131 = vector.broadcast %130 : vector<16x1xf32> to vector<16x128xf32>
    %132 = arith.addf %129, %131 : vector<16x128xf32>
    %cst_87 = arith.constant 0.000000e+00 : f32
    %133 = vector.broadcast %cst_87 : f32 to vector<16x128xf32>
    %134 = arith.maximumf %132, %133 : vector<16x128xf32>
    %135 = arith.mulf %134, %134 : vector<16x128xf32>
    %c0_88 = arith.constant 0 : index
    %c0_89 = arith.constant 0 : index
    %136 = vector.load %arg9[%c0_88, %c0_89] : memref<128x128xf32, #tpu.memory_space<vmem>>, vector<128x128xf32>
    %cst_90 = arith.constant dense<0.000000e+00> : vector<16x128xf32>
    %137 = tpu.matmul %135, %136, %cst_90 {dimension_numbers = #tpu.dot_dimension_numbers<[1], [0], [0], [1], [0, 0, 1, 1], [], []>} : vector<16x128xf32>, vector<128x128xf32>, vector<16x128xf32> -> vector<16x128xf32>
    %cst_91 = arith.constant 1.000000e-24 : f32
    %138 = vector.broadcast %cst_91 : f32 to vector<16x128xf32>
    %139 = arith.maximumf %137, %138 : vector<16x128xf32>
    %140 = math.rsqrt %139 : vector<16x128xf32>
    %141 = arith.mulf %134, %140 : vector<16x128xf32>
    %142 = vector.extract_strided_slice %141 {offsets = [0, 0], sizes = [16, 64], strides = [1, 1]} : vector<16x128xf32> to vector<16x64xf32>
    %c0_92 = arith.constant 0 : index
    %c0_93 = arith.constant 0 : index
    %c0_94 = arith.constant 0 : index
    %143 = vector.load %arg10[%c0_92, %c0_93, %c0_94] : memref<1x16x64xf32, #tpu.memory_space<vmem>>, vector<1x16x64xf32>
    %144 = vector.shape_cast %143 : vector<1x16x64xf32> to vector<16x64xf32>
    %145 = vector.shape_cast %142 : vector<16x64xf32> to vector<1x16x64xf32>
    tpu.vector_store %arg10[%c0_92, %c0_93, %c0_94], %145 {strides = array<i32>} : memref<1x16x64xf32, #tpu.memory_space<vmem>>, vector<1x16x64xf32>,
    return
  }
  func.func @transform_0(%arg0: i32) -> (i32, i32, i32) {
    %c0_i32 = arith.constant 0 : i32
    %c0_i32_0 = arith.constant 0 : i32
    %c0_i32_1 = arith.constant 0 : i32
    return %arg0, %c0_i32, %c0_i32_0 : i32, i32, i32
  }
  func.func @transform_1(%arg0: i32) -> (i32, i32, i32) {
    %c0_i32 = arith.constant 0 : i32
    %c0_i32_0 = arith.constant 0 : i32
    %c0_i32_1 = arith.constant 0 : i32
    %c0_i32_2 = arith.constant 0 : i32
    return %c0_i32, %c0_i32_0, %c0_i32_1 : i32, i32, i32
  }
  func.func @transform_2(%arg0: i32) -> (i32, i32) {
    %c0_i32 = arith.constant 0 : i32
    %c0_i32_0 = arith.constant 0 : i32
    %c0_i32_1 = arith.constant 0 : i32
    return %c0_i32, %c0_i32_0 : i32, i32
  }
  func.func @transform_3(%arg0: i32) -> (i32, i32, i32) {
    %c0_i32 = arith.constant 0 : i32
    %c0_i32_0 = arith.constant 0 : i32
    %c0_i32_1 = arith.constant 0 : i32
    %c0_i32_2 = arith.constant 0 : i32
    return %c0_i32, %c0_i32_0, %c0_i32_1 : i32, i32, i32
  }
  func.func @transform_4(%arg0: i32) -> (i32, i32) {
    %c0_i32 = arith.constant 0 : i32
    %c0_i32_0 = arith.constant 0 : i32
    %c0_i32_1 = arith.constant 0 : i32
    return %c0_i32, %c0_i32_0 : i32, i32
  }
  func.func @transform_5(%arg0: i32) -> (i32, i32) {
    %c0_i32 = arith.constant 0 : i32
    %c0_i32_0 = arith.constant 0 : i32
    %c0_i32_1 = arith.constant 0 : i32
    return %c0_i32, %c0_i32_0 : i32, i32
  }
  func.func @transform_6(%arg0: i32) -> (i32, i32) {
    %c0_i32 = arith.constant 0 : i32
    %c0_i32_0 = arith.constant 0 : i32
    %c0_i32_1 = arith.constant 0 : i32
    return %c0_i32, %c0_i32_0 : i32, i32
  }
  func.func @transform_7(%arg0: i32) -> (i32, i32) {
    %c0_i32 = arith.constant 0 : i32
    %c0_i32_0 = arith.constant 0 : i32
    %c0_i32_1 = arith.constant 0 : i32
    return %c0_i32, %c0_i32_0 : i32, i32
  }
  func.func @transform_8(%arg0: i32) -> (i32, i32) {
    %c0_i32 = arith.constant 0 : i32
    %c0_i32_0 = arith.constant 0 : i32
    %c0_i32_1 = arith.constant 0 : i32
    return %c0_i32, %c0_i32_0 : i32, i32
  }
  func.func @transform_9(%arg0: i32) -> (i32, i32, i32) {
    %c0_i32 = arith.constant 0 : i32
    %c0_i32_0 = arith.constant 0 : i32
    %c0_i32_1 = arith.constant 0 : i32
    return %arg0, %c0_i32, %c0_i32_0 : i32, i32, i32
  }
}

</mosaic_0001>

<bundles_post_ra>
// kernel: vgg_conv_auto_forward.1
= control target key start
LH: loop header
LB: loop body
LE: loop exit
PB: predicated region body
PF: predicated region fallthrough
CT: control target
= control target key end

     0   :  { %14 = vsyncpa [#allocation3], 0  ;;  %s6009_s0 = inlined_call_operand.vmem [shape: f32[2,8,512], index: 0, kind: input, shape index: {}]   ;;  %s6010_s1 = inlined_call_operand.vmem [shape: f32[9,8,8], index: 1, kind: input, shape index: {}]   ;;  %s6011_s2 = inlined_call_operand.vmem [shape: f32[8,1], index: 2, kind: input, shape index: {}]   ;;  %s6012_s3 = inlined_call_operand.vmem [shape: f32[9,16,8], index: 3, kind: input, shape index: {}]   ;;  %s6013_s4 = inlined_call_operand.vmem [shape: f32[16,1], index: 4, kind: input, shape index: {}]   ;;  %s6014_s5 = inlined_call_operand.vmem [shape: f32[1,384], index: 5, kind: input, shape index: {}]   ;;  %s6015_s6 = inlined_call_operand.vmem [shape: f32[384,512], index: 6, kind: input, shape index: {}]   ;;  %s6016_s7 = inlined_call_operand.hbm [shape: f32[384,128], index: 7, kind: input, shape index: {}]   ;;  %s6017_s8 = inlined_call_operand.hbm [shape: f32[128,128], index: 8, kind: input, shape index: {}]   ;;  %s6018_s9 = inlined_call_operand.vmem [shape: f32[2,16,64], index: 9, kind: output, shape index: {}]  }
   0x1   :  { %15 = vsyncpa [#allocation5], 0  ;;  %s4925_s30 = smov 0  }
   0x2 LB: > { %s4931_s10 = sadd.s32 4294967295, %s4858_s30   ;;  %p4370_p0 = scmp.ge.s32.totalorder %s4858_s30, 1  ;;  %s4858_s30 = sphi %s4925_s30, %s21_s30  }
   0x3   : > { %p246_p1 = scmp.lt.s32.totalorder %s4858_s30, 3  ;;  %s4860_s11 = smov [#allocation2]  }
   0x4   : > { %s276_s12 = sshll.u32 %s4860_s11, 4  ;;  %p4757_p3 = scmp.eq.s32.totalorder %s4931_s10, 0  ;;  %s277_s12 = int_to_ptr.vmem [resolvable:$true] %s276_s12 }
   0x5   : > { %p4935_p2 = pnand %p4370_p0, %p246_p1  ;;  %s4861_s14 = smov [#allocation4]  }
   0x6   : > { %s289_s15 = sshll.u32 %s4861_s14, 4  ;;  %s4803_s17 = scalar_lea.vmem %s277_s12, 6144  ;;  %s290_s15 = int_to_ptr.vmem [resolvable:$true] %s289_s15 }
   0x7   : > { %p4750_p4 = pneg %p4935_p2  ;;  %p4804_p7 = scmp.ne.s32.totalorder %s277_s12, %s4803_s17 }
   0x8   : > { %p4811_p10 = scmp.lt.s32.totalorder %s277_s12, %s277_s12  ;;  %p4812_p11 = scmp.lt.s32.totalorder %s4803_s17, %s4803_s17 }
   0x9   : > { %p4944_p5 = pnand %p4757_p3, %p4750_p4 }
   0xa   : > { %p4813_p12 = por %p4812_p11, %p4811_p10 }
   0xb   : > { %p4794_p6 = pneg %p4944_p5 }
   0xd   : > { %p4806_p8 = pnand %p4804_p7, %p4794_p6 }
   0xf   : > { %p4807_p9 = pneg %p4806_p8 }
  0x11   : > { %p4814_p13 = pnand %p4813_p12, %p4807_p9 }
  0x13   : > { %4817 = shalt.err (!%p4814_p13)
}
  0x14   : > { %s4862_s18 = smov 128   ;;  %s4863_s19 = smov 8  }
  0x15   : > { %4753 = dma.hbm_to_vmem [thread:$0]  (!%p4944_p5), %s6016_s7, 6144, %s277_s12, [#allocation3], %s4862_s18, %s4862_s18, %s4863_s19  }
  0x16   : > { %s4829_s22 = scalar_lea.vmem %s290_s15, 2048  ;;  %p4837_p7 = scmp.lt.s32.totalorder %s290_s15, %s290_s15 }
  0x17   : > { %p4830_p0 = scmp.ne.s32.totalorder %s290_s15, %s4829_s22  ;;  %p4838_p8 = scmp.lt.s32.totalorder %s4829_s22, %s4829_s22 }
  0x19   : > { %p4832_p1 = pnand %p4830_p0, %p4794_p6  ;;  %p4839_p10 = por %p4838_p8, %p4837_p7 }
  0x1b   : > { %p4833_p4 = pneg %p4832_p1 }
  0x1d   : > { %p4840_p9 = pnand %p4839_p10, %p4833_p4 }
  0x1f   : > { %4843 = shalt.err (!%p4840_p9)
}
  0x20   : > { %4756 = dma.hbm_to_vmem [thread:$0]  (!%p4944_p5), %s6017_s8, 2048, %s290_s15, [#allocation5], %s4862_s18, %s4862_s18, %s4863_s19  }
  0x21   : > { %313 = sbr.rel (%p4935_p2) target bundleno = 1820 (0x71c), region = 56 }
  0x26   : > { %4849 = dma.done.wait (%p4757_p3), [#allocation3], 6144  }
  0x27   : > { %4851 = vsyncadd (%p4757_p3), [#allocation3], 4294961152 }
  0x28   : > { %4853 = dma.done.wait (%p4757_p3), [#allocation5], 2048  }
  0x29   : > { %4855 = vsyncadd (%p4757_p3), [#allocation5], 4294965248  ;;  %p353_p6 = scmp.lt.s32.totalorder %s4931_s10, 1  ;;  %v4864_v0 = vmov 0.0   ;;  %vm4865_vm0 = vmmov 0   ;;  %s4866_s29 = smov 127  }
  0x2a   : > { %4582 = vmatprep.subr.mxu1 %v4864_v0  ;;  %457 = vmatprep.mubr.f32.mxu0 %v4864_v0  ;;  %s4867_s11 = smov 126   ;;  %s4868_s12 = smov 104   ;;  %v4873_v5 = vmov 0   ;;  %v1826_v6 = vld [vmem:[%s6011_s2] sm:$0xff]  ;;  %vm382_vm1 = vcmask 1039360   ;;  %v4381_v13 = vld [vmem:[%s6010_s1 + $0x8] sm:$0xff] }
  0x2b   : > { %s6022_s10 = smov (!%p353_p6, %s4931_s10), 1  ;;  %4584 = vmatprep.mubr.msk.f32.mxu1 %vm4865_vm0, %v4864_v0  ;;  %s4869_s13 = smov 103   ;;  %4784 = vset.pattern.permute.xlu0 %v4873_v5  ;;  %vm389_vm2 = vcmask 64512   ;;  %vm688_vm3 = vcmask 1031168   ;;  %v367_v18 = vld [vmem:[%s6010_s1] sm:$0xff]  ;;  %v4386_v22 = vld [vmem:[%s6010_s1 + $0x10] sm:$0xff] }
  0x2c   : > { %s4461_s25 = sshll.u32 %s6022_s10, 5  ;;  %s4870_s14 = smov 102   ;;  %4785 = vset.pattern.permute.xlu1 %v4873_v5  ;;  %vm852_vm4 = vcmask 850944   ;;  %v4389_v29 = vld [vmem:[%s6010_s1 + $0x18] sm:$0xff]  ;;  %vm1016_vm5 = vcmask 842752   ;;  %v4392_v37 = vld [vmem:[%s6010_s1 + $0x20] sm:$0xff] }
  0x2d   : > { %s357_s28 = scalar_lea.vmem %s6009_s0, %s4461_s25  ;;  %s4871_s15 = smov 80   ;;  %vm1180_vm6 = vcmask 834560   ;;  %v4395_v45 = vld [vmem:[%s6010_s1 + $0x28] sm:$0xff]  ;;  %vm1344_vm7 = vcmask 654336   ;;  %v4398_v53 = vld [vmem:[%s6010_s1 + $0x30] sm:$0xff]  ;;  %vm1508_vm8 = vcmask 646144  }
  0x2e   : > { %v4986_v1 = vld [vmem:[%s357_s28 + $0x8] sm:$0xff]  ;;  %v4988_v2 = vld [vmem:[%s357_s28] sm:$0xff]  ;;  %v4996_v3 = vld [vmem:[%s357_s28 + $0x10] sm:$0xff]  ;;  %s4872_s16 = smov 79   ;;  %s4874_s17 = smov 78   ;;  %vm1672_vm9 = vcmask 637952  }
  0x2f   : > { %376 = vrot.lane.b32.xlu0 %v4986_v1, %s4866_s29  ;;  %374 = vrot.lane.b32.xlu1 %v4988_v2, %s4866_s29  ;;  %v366_v4 = vld [vmem:[%s357_s28 + $0x18] sm:$0xff]  ;;  %s4462_s19 = sshll.u32 %s6022_s10, 4  ;;  %vm4288_vm10 = vcmask 523264  }
  0x30   : > { %v4401_v61 = vld [vmem:[%s6010_s1 + $0x38] sm:$0xff] }
  0x33   : > { %378 = vrot.lane.b32.xlu0 %v4996_v3, %s4866_s29  ;;  %380 = vrot.lane.b32.xlu1 %v366_v4, %s4866_s29 }
  0x37   : > { %682 = vrot.lane.b32.xlu0 %v4986_v1, %s4867_s11  ;;  %684 = vrot.lane.b32.xlu1 %v4996_v3, %s4867_s11 }
  0x3b   : > { %680 = vrot.lane.b32.xlu0 %v4988_v2, %s4867_s11  ;;  %846 = vrot.lane.b32.xlu1 %v4986_v1, %s4868_s12 }
  0x3f   : > { %848 = vrot.lane.b32.xlu0 %v4996_v3, %s4868_s12  ;;  %686 = vrot.lane.b32.xlu1 %v366_v4, %s4867_s11 }
  0x43   : > { %844 = vrot.lane.b32.xlu0 %v4988_v2, %s4868_s12  ;;  %1010 = vrot.lane.b32.xlu1 %v4986_v1, %s4869_s13 }
  0x47   : > { %1012 = vrot.lane.b32.xlu0 %v4996_v3, %s4869_s13  ;;  %850 = vrot.lane.b32.xlu1 %v366_v4, %s4868_s12 }
  0x4b   : > { %1008 = vrot.lane.b32.xlu0 %v4988_v2, %s4869_s13  ;;  %1174 = vrot.lane.b32.xlu1 %v4986_v1, %s4870_s14 }
  0x4f   : > { %1176 = vrot.lane.b32.xlu0 %v4996_v3, %s4870_s14  ;;  %1014 = vrot.lane.b32.xlu1 %v366_v4, %s4869_s13 }
  0x53   : > { %1172 = vrot.lane.b32.xlu0 %v4988_v2, %s4870_s14  ;;  %1338 = vrot.lane.b32.xlu1 %v4986_v1, %s4871_s15 }
  0x57   : > { %1340 = vrot.lane.b32.xlu0 %v4996_v3, %s4871_s15  ;;  %1178 = vrot.lane.b32.xlu1 %v366_v4, %s4870_s14 }
  0x5b   : > { %1336 = vrot.lane.b32.xlu0 %v4988_v2, %s4871_s15  ;;  %1502 = vrot.lane.b32.xlu1 %v4986_v1, %s4872_s16 }
  0x5f   : > { %1504 = vrot.lane.b32.xlu0 %v4996_v3, %s4872_s16  ;;  %1342 = vrot.lane.b32.xlu1 %v366_v4, %s4871_s15 }
  0x63   : > { %1500 = vrot.lane.b32.xlu0 %v4988_v2, %s4872_s16  ;;  %1666 = vrot.lane.b32.xlu1 %v4986_v1, %s4874_s17 }
  0x67   : > { %1668 = vrot.lane.b32.xlu0 %v4996_v3, %s4874_s17  ;;  %1506 = vrot.lane.b32.xlu1 %v366_v4, %s4872_s16 }
  0x6b   : > { %1664 = vrot.lane.b32.xlu0 %v4988_v2, %s4874_s17  ;;  %1670 = vrot.lane.b32.xlu1 %v366_v4, %s4874_s17 }
  0x6f   : > { %1829 = vperm.xlu0 %4784, %v1826_v6   ;;  %v4404_v6 = vld [vmem:[%s6010_s1 + $0x40] sm:$0xff] }
  0xa1   : > { %v377_v7 = vpop.permute.xlu0 %376  ;;  %v375_v8 = vpop.permute.xlu1 %374 }
  0xa2   : > { %v383_v14 = vsel %vm382_vm1, %v375_v8, %v377_v7 }
  0xa5   : > { %v379_v9 = vpop.permute.xlu0 %378  ;;  %v381_v10 = vpop.permute.xlu1 %380 }
  0xa6   : > { %v384_v11 = vsel %vm382_vm1, %v377_v7, %v379_v9  ;;  %v385_v12 = vsel %vm382_vm1, %v379_v9, %v381_v10 }
  0xa7   : > { %423 = vmatprep.subr.mxu0 %v384_v11  ;;  %4583 = vmatpush3.msra.mxu1 %v385_v12 }
  0xa8   : > { %424 = vmatpush1.msra.mxu0 %v383_v14  ;;  %4585 = vmatmul.mubr.msk.f32.vlgmr.msra.gmra.mxu1 %vm389_vm2, %v4381_v13 }
  0xa9   : > { %v683_v15 = vpop.permute.xlu0 %682  ;;  %567 = vmatprep.subr.mxu0 %v4986_v1  ;;  %v685_v16 = vpop.permute.xlu1 %684  ;;  %4382 = vmatmul.mubr.msk.f32.vlgmr.msra.gmra.mxu0 %vm389_vm2, %v4381_v13 }
  0xaa   : > { %568 = vmatpush1.msra.mxu0 %v4988_v2  ;;  %v690_v17 = vsel %vm688_vm3, %v683_v15, %v685_v16  ;;  %601 = vmatprep.mubr.f32.mxu0 %v4864_v0 }
  0xab   : > { %728 = vmatprep.subr.mxu0 %v690_v17  ;;  %4587 = vmatprep.subr.mxu1 %v4864_v0 }
  0xac   : > { %4588 = vmatpush3.msra.mxu1 %v4996_v3  ;;  %4589 = vmatprep.mubr.msk.f32.mxu1 %vm4865_vm0, %v4864_v0 }
  0xad   : > { %v681_v19 = vpop.permute.xlu0 %680  ;;  %v847_v20 = vpop.permute.xlu1 %846  ;;  %4384 = vmatmul.mubr.msk.f32.vlgmr.msra.gmra.mxu0 %vm389_vm2, %v367_v18  ;;  %4592 = vmatprep.subr.mxu1 %v4864_v0 }
  0xae   : > { %v689_v21 = vsel %vm688_vm3, %v681_v19, %v683_v15  ;;  %4590 = vmatmul.mubr.msk.f32.vlgmr.msra.gmra.mxu1 %vm389_vm2, %v367_v18  ;;  %762 = vmatprep.mubr.f32.mxu0 %v4864_v0 }
  0xaf   : > { %729 = vmatpush1.msra.mxu0 %v689_v21  ;;  %4594 = vmatprep.mubr.msk.f32.mxu1 %vm4865_vm0, %v4864_v0 }
  0xb1   : > { %v849_v23 = vpop.permute.xlu0 %848  ;;  %v687_v24 = vpop.permute.xlu1 %686  ;;  %4387 = vmatmul.mubr.msk.f32.vlgmr.msra.gmra.mxu0 %vm389_vm2, %v4386_v22 }
  0xb2   : > { %v691_v25 = vsel %vm688_vm3, %v685_v16, %v687_v24  ;;  %v854_v26 = vsel %vm852_vm4, %v847_v20, %v849_v23  ;;  %926 = vmatprep.mubr.f32.mxu0 %v4864_v0 }
  0xb3   : > { %4593 = vmatpush3.msra.mxu1 %v691_v25  ;;  %892 = vmatprep.subr.mxu0 %v854_v26 }
  0xb4   : > { %4597 = vmatprep.subr.mxu1 %v4864_v0  ;;  %4595 = vmatmul.mubr.msk.f32.vlgmr.msra.gmra.mxu1 %vm389_vm2, %v4386_v22 }
  0xb5   : > { %v845_v27 = vpop.permute.xlu0 %844  ;;  %v1011_v28 = vpop.permute.xlu1 %1010  ;;  %4599 = vmatprep.mubr.msk.f32.mxu1 %vm4865_vm0, %v4864_v0 }
  0xb6   : > { %v853_v30 = vsel %vm852_vm4, %v845_v27, %v847_v20 }
  0xb7   : > { %893 = vmatpush1.msra.mxu0 %v853_v30 }
  0xb8   : > { %4390 = vmatmul.mubr.msk.f32.vlgmr.msra.gmra.mxu0 %vm389_vm2, %v4389_v29 }
  0xb9   : > { %v1013_v31 = vpop.permute.xlu0 %1012  ;;  %v851_v32 = vpop.permute.xlu1 %850  ;;  %1090 = vmatprep.mubr.f32.mxu0 %v4864_v0 }
  0xba   : > { %v855_v33 = vsel %vm852_vm4, %v849_v23, %v851_v32  ;;  %v1018_v34 = vsel %vm1016_vm5, %v1011_v28, %v1013_v31 }
  0xbb   : > { %4598 = vmatpush3.msra.mxu1 %v855_v33  ;;  %1056 = vmatprep.subr.mxu0 %v1018_v34 }
  0xbc   : > { %4602 = vmatprep.subr.mxu1 %v4864_v0  ;;  %4600 = vmatmul.mubr.msk.f32.vlgmr.msra.gmra.mxu1 %vm389_vm2, %v4389_v29 }
  0xbd   : > { %v1009_v35 = vpop.permute.xlu0 %1008  ;;  %v1175_v36 = vpop.permute.xlu1 %1174  ;;  %4604 = vmatprep.mubr.msk.f32.mxu1 %vm4865_vm0, %v4864_v0 }
  0xbe   : > { %v1017_v38 = vsel %vm1016_vm5, %v1009_v35, %v1011_v28 }
  0xbf   : > { %1057 = vmatpush1.msra.mxu0 %v1017_v38 }
  0xc0   : > { %4393 = vmatmul.mubr.msk.f32.vlgmr.msra.gmra.mxu0 %vm389_vm2, %v4392_v37 }
  0xc1   : > { %v1177_v39 = vpop.permute.xlu0 %1176  ;;  %v1015_v40 = vpop.permute.xlu1 %1014  ;;  %1254 = vmatprep.mubr.f32.mxu0 %v4864_v0 }
  0xc2   : > { %v1019_v41 = vsel %vm1016_vm5, %v1013_v31, %v1015_v40  ;;  %v1182_v42 = vsel %vm1180_vm6, %v1175_v36, %v1177_v39 }
  0xc3   : > { %4603 = vmatpush3.msra.mxu1 %v1019_v41  ;;  %1220 = vmatprep.subr.mxu0 %v1182_v42 }
  0xc4   : > { %4605 = vmatmul.mubr.msk.f32.vlgmr.msra.gmra.mxu1 %vm389_vm2, %v4392_v37  ;;  %4607 = vmatprep.subr.mxu1 %v4864_v0 }
  0xc5   : > { %v1173_v43 = vpop.permute.xlu0 %1172  ;;  %v1339_v44 = vpop.permute.xlu1 %1338  ;;  %4609 = vmatprep.mubr.msk.f32.mxu1 %vm4865_vm0, %v4864_v0 }
  0xc6   : > { %v1181_v46 = vsel %vm1180_vm6, %v1173_v43, %v1175_v36 }
  0xc7   : > { %1221 = vmatpush1.msra.mxu0 %v1181_v46 }
  0xc8   : > { %4396 = vmatmul.mubr.msk.f32.vlgmr.msra.gmra.mxu0 %vm389_vm2, %v4395_v45 }
  0xc9   : > { %v1341_v47 = vpop.permute.xlu0 %1340  ;;  %v1179_v48 = vpop.permute.xlu1 %1178  ;;  %1418 = vmatprep.mubr.f32.mxu0 %v4864_v0 }
  0xca   : > { %v1183_v49 = vsel %vm1180_vm6, %v1177_v39, %v1179_v48  ;;  %v1346_v50 = vsel %vm1344_vm7, %v1339_v44, %v1341_v47  ;;  %v1840_v48 = vlaneseq }
  0xcb   : > { %4608 = vmatpush3.msra.mxu1 %v1183_v49  ;;  %1384 = vmatprep.subr.mxu0 %v1346_v50 }
  0xcc   : > { %4610 = vmatmul.mubr.msk.f32.vlgmr.msra.gmra.mxu1 %vm389_vm2, %v4395_v45  ;;  %4612 = vmatprep.subr.mxu1 %v4864_v0 }
  0xcd   : > { %v1337_v51 = vpop.permute.xlu0 %1336  ;;  %v1503_v52 = vpop.permute.xlu1 %1502  ;;  %4614 = vmatprep.mubr.msk.f32.mxu1 %vm4865_vm0, %v4864_v0 }
  0xce   : > { %v1345_v54 = vsel %vm1344_vm7, %v1337_v51, %v1339_v44 }
  0xcf   : > { %1385 = vmatpush1.msra.mxu0 %v1345_v54  ;;  %v1841_v54 = vshrl.u32 %v1840_v48, 7  ;;  %v1916_v48 = vld [vmem:[%s6015_s6 + $0xa8] sm:$0xff] }
  0xd0   : > { %4399 = vmatmul.mubr.msk.f32.vlgmr.msra.gmra.mxu0 %vm389_vm2, %v4398_v53 }
  0xd1   : > { %v1505_v55 = vpop.permute.xlu0 %1504  ;;  %v1343_v56 = vpop.permute.xlu1 %1342  ;;  %1582 = vmatprep.mubr.f32.mxu0 %v4864_v0 }
  0xd2   : > { %v1347_v57 = vsel %vm1344_vm7, %v1341_v47, %v1343_v56  ;;  %v1510_v58 = vsel %vm1508_vm8, %v1503_v52, %v1505_v55 }
  0xd3   : > { %4613 = vmatpush3.msra.mxu1 %v1347_v57  ;;  %1548 = vmatprep.subr.mxu0 %v1510_v58 }
  0xd4   : > { %4615 = vmatmul.mubr.msk.f32.vlgmr.msra.gmra.mxu1 %vm389_vm2, %v4398_v53  ;;  %4617 = vmatprep.subr.mxu1 %v4864_v0 }
  0xd5   : > { %v1501_v59 = vpop.permute.xlu0 %1500  ;;  %v1667_v60 = vpop.permute.xlu1 %1666  ;;  %4619 = vmatprep.mubr.msk.f32.mxu1 %vm4865_vm0, %v4864_v0 }
  0xd6   : > { %v1509_v62 = vsel %vm1508_vm8, %v1501_v59, %v1503_v52 }
  0xd7   : > { %1549 = vmatpush1.msra.mxu0 %v1509_v62 }
  0xd8   : > { %4402 = vmatmul.mubr.msk.f32.vlgmr.msra.gmra.mxu0 %vm389_vm2, %v4401_v61 }
  0xd9   : > { %v1669_v63 = vpop.permute.xlu0 %1668  ;;  %v1507_v1 = vpop.permute.xlu1 %1506  ;;  %1746 = vmatprep.mubr.f32.mxu0 %v4864_v0 }
  0xda   : > { %v1511_v2 = vsel %vm1508_vm8, %v1505_v55, %v1507_v1  ;;  %v1674_v3 = vsel %vm1672_vm9, %v1667_v60, %v1669_v63 }
  0xdb   : > { %4618 = vmatpush3.msra.mxu1 %v1511_v2  ;;  %1712 = vmatprep.subr.mxu0 %v1674_v3  ;;  %v1842_v3 = vsub.s32 0, %v1841_v54 }
  0xdc   : > { %4620 = vmatmul.mubr.msk.f32.vlgmr.msra.gmra.mxu1 %vm389_vm2, %v4401_v61  ;;  %4622 = vmatprep.subr.mxu1 %v4864_v0 }
  0xdd   : > { %v1665_v4 = vpop.permute.xlu0 %1664  ;;  %v1671_v5 = vpop.permute.xlu1 %1670  ;;  %4624 = vmatprep.mubr.msk.f32.mxu1 %vm4865_vm0, %v4864_v0 }
  0xde   : > { %v1673_v7 = vsel %vm1672_vm9, %v1665_v4, %v1667_v60  ;;  %v1675_v8 = vsel %vm1672_vm9, %v1669_v63, %v1671_v5 }
  0xdf   : > { %1713 = vmatpush1.msra.mxu0 %v1673_v7  ;;  %4623 = vmatpush3.msra.mxu1 %v1675_v8  ;;  %v1846_v7 = vsub.s32 1, %v1841_v54 }
  0xe0   : > { %4405 = vmatmul.mubr.msk.f32.vlgmr.msra.gmra.mxu0 %vm389_vm2, %v4404_v6  ;;  %4625 = vmatmul.mubr.msk.f32.vlgmr.msra.gmra.mxu1 %vm389_vm2, %v4404_v6 }
  0xe1   : > { %2222 = vmatprep.mubr.f32.mxu1 %v4864_v0 }
  0xea   : > { %v1830_v63 = vpop.permute.xlu0 %1829 }
 0x168   : > { %v530_v9 = vpop.f32.mrf.mxu1 }
 0x169   : > { %v459_v10 = vpop.f32.mrf.mxu0 }
 0x16a   : > { %v4586_v11 = vpop.f32.mrf.mxu1 }
 0x16b   : > { %v461_v12 = vpop.f32.mrf.mxu0 }
 0x16d   : > { %v603_v13 = vpop.f32.mrf.mxu0 }
 0x16e   : > { %v674_v14 = vpop.f32.mrf.mxu1  ;;  %v604_v29 = vadd.f32 %v603_v13, %v459_v10 }
 0x16f   : > { %v605_v16 = vpop.f32.mrf.mxu0  ;;  %v675_v30 = vadd.f32 %v674_v14, %v530_v9  ;;  %v1838_v9 = vld [vmem:[%s6014_s5] sm:$0x7]  ;;  %v1850_v14 = vsub.s32 2, %v1841_v54  ;;  %v1904_v54 = vld [vmem:[%s6015_s6 + $0x48] sm:$0xff] }
 0x170   : > { %v4591_v15 = vpop.f32.mrf.mxu1  ;;  %v606_v34 = vadd.f32 %v605_v16, %v461_v12 }
 0x171   : > { %v764_v18 = vpop.f32.mrf.mxu0 }
 0x172   : > { %v839_v35 = vadd.f32 %v764_v18, %v604_v29  ;;  %v5170_v18 = vrot.slane %v1838_v9, %v1842_v3  ;;  %v1952_v29 = vld [vmem:[%s6015_s6 + $0x1c8] sm:$0xff] }
 0x173   : > { %v766_v20 = vpop.f32.mrf.mxu0 }
 0x174   : > { %v835_v17 = vpop.f32.mrf.mxu1  ;;  %v840_v38 = vadd.f32 %v766_v20, %v606_v34  ;;  %v1943_v34 = vld [vmem:[%s6015_s6 + $0x180] sm:$0xff] }
 0x175   : > { %v841_v36 = vadd.f32 %v835_v17, %v675_v30  ;;  %v5168_v17 = vrot.slane %v1838_v9, %v1846_v7  ;;  %v1951_v30 = vld [vmem:[%s6015_s6 + $0x1c0] sm:$0xff] }
 0x176   : > { %v4596_v19 = vpop.f32.mrf.mxu1 }
 0x178   : > { %v928_v22 = vpop.f32.mrf.mxu0 }
 0x179   : > { %v1003_v39 = vadd.f32 %v928_v22, %v839_v35  ;;  %v1940_v35 = vld [vmem:[%s6015_s6 + $0x168] sm:$0xff] }
 0x17a   : > { %v930_v24 = vpop.f32.mrf.mxu0 }
 0x17b   : > { %v1004_v44 = vadd.f32 %v930_v24, %v840_v38  ;;  %v1935_v38 = vld [vmem:[%s6015_s6 + $0x140] sm:$0xff] }
 0x17c   : > { %v999_v21 = vpop.f32.mrf.mxu1 }
 0x17d   : > { %v1005_v40 = vadd.f32 %v999_v21, %v841_v36  ;;  %v5174_v21 = vrot.slane %v1838_v9, %v1850_v14  ;;  %v1939_v36 = vld [vmem:[%s6015_s6 + $0x160] sm:$0xff] }
 0x17e   : > { %v4601_v23 = vpop.f32.mrf.mxu1 }
 0x180   : > { %v1092_v26 = vpop.f32.mrf.mxu0 }
 0x181   : > { %v1167_v45 = vadd.f32 %v1092_v26, %v1003_v39  ;;  %v1932_v39 = vld [vmem:[%s6015_s6 + $0x128] sm:$0xff] }
 0x182   : > { %v1094_v28 = vpop.f32.mrf.mxu0 }
 0x183   : > { %v1168_v50 = vadd.f32 %v1094_v28, %v1004_v44  ;;  %v1955_v28 = vld [vmem:[%s6015_s6 + $0x1e0] sm:$0xff]  ;;  %v1924_v44 = vld [vmem:[%s6015_s6 + $0xe8] sm:$0xff] }
 0x184   : > { %v1163_v25 = vpop.f32.mrf.mxu1 }
 0x185   : > { %v1169_v46 = vadd.f32 %v1163_v25, %v1005_v40  ;;  %v2084_v40 = vld [vmem:[%s6015_s6 + $0x5e8] sm:$0xff] }
 0x186   : > { %v4606_v27 = vpop.f32.mrf.mxu1  ;;  %2158 = vmatprep.subr.mxu1 %v2084_v40  ;;  %v1996_v40 = vld [vmem:[%s6015_s6 + $0x328] sm:$0xff] }
 0x187   : > { %v1956_v27 = vld [vmem:[%s6015_s6 + $0x1e8] sm:$0xff] }
 0x188   : > { %v1256_v32 = vpop.f32.mrf.mxu0  ;;  %2087 = vmatprep.subr.mxu0 %v1956_v27  ;;  %v2072_v27 = vld [vmem:[%s6015_s6 + $0x588] sm:$0xff] }
 0x189   : > { %v1331_v51 = vadd.f32 %v1256_v32, %v1167_v45  ;;  %2088 = vmatpush1.msra.mxu0 %v1955_v28  ;;  %v1947_v32 = vld [vmem:[%s6015_s6 + $0x1a0] sm:$0xff]  ;;  %v2008_v28 = vld [vmem:[%s6015_s6 + $0x388] sm:$0xff] }
 0x18a   : > { %v1258_v37 = vpop.f32.mrf.mxu0  ;;  %2089 = vmatprep.subr.mxu0 %v1952_v29  ;;  %v1923_v45 = vld [vmem:[%s6015_s6 + $0xe0] sm:$0xff] }
 0x18b   : > { %v1332_v55 = vadd.f32 %v1258_v37, %v1168_v50  ;;  %2090 = vmatpush1.msra.mxu0 %v1951_v30  ;;  %v1936_v37 = vld [vmem:[%s6015_s6 + $0x148] sm:$0xff]  ;;  %v2071_v29 = vld [vmem:[%s6015_s6 + $0x580] sm:$0xff] }
 0x18c   : > { %v1327_v31 = vpop.f32.mrf.mxu1  ;;  %v1912_v50 = vld [vmem:[%s6015_s6 + $0x88] sm:$0xff]  ;;  %v2007_v30 = vld [vmem:[%s6015_s6 + $0x380] sm:$0xff] }
 0x18d   : > { %v1333_v52 = vadd.f32 %v1327_v31, %v1169_v46  ;;  %v1948_v31 = vld [vmem:[%s6015_s6 + $0x1a8] sm:$0xff] }
 0x18e   : > { %v4611_v33 = vpop.f32.mrf.mxu1  ;;  %2091 = vmatprep.subr.mxu0 %v1948_v31  ;;  %v1920_v46 = vld [vmem:[%s6015_s6 + $0xc8] sm:$0xff] }
 0x18f   : > { %v1944_v33 = vld [vmem:[%s6015_s6 + $0x188] sm:$0xff]  ;;  %2092 = vmatpush1.msra.mxu0 %v1947_v32 }
 0x190   : > { %v1420_v41 = vpop.f32.mrf.mxu0  ;;  %2093 = vmatprep.subr.mxu0 %v1944_v33  ;;  %v2068_v31 = vld [vmem:[%s6015_s6 + $0x568] sm:$0xff]  ;;  %v2067_v33 = vld [vmem:[%s6015_s6 + $0x560] sm:$0xff] }
 0x191   : > { %v1495_v56 = vadd.f32 %v1420_v41, %v1331_v51  ;;  %2094 = vmatpush1.msra.mxu0 %v1943_v34  ;;  %v1931_v41 = vld [vmem:[%s6015_s6 + $0x120] sm:$0xff]  ;;  %v2004_v32 = vld [vmem:[%s6015_s6 + $0x368] sm:$0xff] }
 0x192   : > { %v1422_v47 = vpop.f32.mrf.mxu0  ;;  %2095 = vmatprep.subr.mxu0 %v1940_v35  ;;  %v1911_v51 = vld [vmem:[%s6015_s6 + $0x80] sm:$0xff]  ;;  %v2064_v35 = vld [vmem:[%s6015_s6 + $0x548] sm:$0xff] }
 0x193   : > { %v1496_v60 = vadd.f32 %v1422_v47, %v1332_v55  ;;  %2096 = vmatpush1.msra.mxu0 %v1939_v36  ;;  %v1919_v47 = vld [vmem:[%s6015_s6 + $0xc0] sm:$0xff]  ;;  %v2000_v36 = vld [vmem:[%s6015_s6 + $0x348] sm:$0xff] }
 0x194   : > { %v1491_v42 = vpop.f32.mrf.mxu1  ;;  %2097 = vmatprep.subr.mxu0 %v1936_v37  ;;  %v1903_v55 = vld [vmem:[%s6015_s6 + $0x40] sm:$0xff] }
 0x195   : > { %v1497_v57 = vadd.f32 %v1491_v42, %v1333_v52  ;;  %2098 = vmatpush1.msra.mxu0 %v1935_v38  ;;  %v1928_v42 = vld [vmem:[%s6015_s6 + $0x108] sm:$0xff]  ;;  %v2003_v34 = vld [vmem:[%s6015_s6 + $0x360] sm:$0xff] }
 0x196   : > { %v4616_v43 = vpop.f32.mrf.mxu1  ;;  %2099 = vmatprep.subr.mxu0 %v1932_v39  ;;  %v1908_v52 = vld [vmem:[%s6015_s6 + $0x68] sm:$0xff]  ;;  %v2063_v37 = vld [vmem:[%s6015_s6 + $0x540] sm:$0xff] }
 0x197   : > { %v1927_v43 = vld [vmem:[%s6015_s6 + $0x100] sm:$0xff]  ;;  %2100 = vmatpush1.msra.mxu0 %v1931_v41  ;;  %v2060_v39 = vld [vmem:[%s6015_s6 + $0x528] sm:$0xff] }
 0x198   : > { %v1584_v49 = vpop.f32.mrf.mxu0  ;;  %2101 = vmatprep.subr.mxu0 %v1928_v42  ;;  %v1999_v38 = vld [vmem:[%s6015_s6 + $0x340] sm:$0xff] }
 0x199   : > { %v1659_v61 = vadd.f32 %v1584_v49, %v1495_v56  ;;  %2102 = vmatpush1.msra.mxu0 %v1927_v43  ;;  %v1915_v49 = vld [vmem:[%s6015_s6 + $0xa0] sm:$0xff]  ;;  %v1900_v56 = vld [vmem:[%s6015_s6 + $0x28] sm:$0xff] }
 0x19a   : > { %v1586_v58 = vpop.f32.mrf.mxu0  ;;  %2103 = vmatprep.subr.mxu0 %v1924_v44  ;;  %v2059_v41 = vld [vmem:[%s6015_s6 + $0x520] sm:$0xff]  ;;  %v2056_v43 = vld [vmem:[%s6015_s6 + $0x508] sm:$0xff] }
 0x19b   : > { %v1660_v4 = vadd.f32 %v1586_v58, %v1496_v60  ;;  %2104 = vmatpush1.msra.mxu0 %v1923_v45  ;;  %v1896_v58 = vld [vmem:[%s6015_s6 + $0x8] sm:$0xff]  ;;  %v1995_v42 = vld [vmem:[%s6015_s6 + $0x320] sm:$0xff] }
 0x19c   : > { %v1655_v53 = vpop.f32.mrf.mxu1  ;;  %2105 = vmatprep.subr.mxu0 %v1920_v46  ;;  %v1992_v44 = vld [vmem:[%s6015_s6 + $0x308] sm:$0xff]  ;;  %v2055_v45 = vld [vmem:[%s6015_s6 + $0x500] sm:$0xff] }
 0x19d   : > { %v1661_v62 = vadd.f32 %v1655_v53, %v1497_v57  ;;  %2106 = vmatpush1.msra.mxu0 %v1919_v47  ;;  %v1907_v53 = vld [vmem:[%s6015_s6 + $0x60] sm:$0xff]  ;;  %v2052_v47 = vld [vmem:[%s6015_s6 + $0x4e8] sm:$0xff] }
 0x19e   : > { %v4621_v59 = vpop.f32.mrf.mxu1  ;;  %2107 = vmatprep.subr.mxu0 %v1916_v48  ;;  %v1899_v57 = vld [vmem:[%s6015_s6 + $0x20] sm:$0xff]  ;;  %v1988_v48 = vld [vmem:[%s6015_s6 + $0x2e8] sm:$0xff] }
 0x19f   : > { %2108 = vmatpush1.msra.mxu0 %v1915_v49  ;;  %v1895_v59 = vld [vmem:[%s6015_s6] sm:$0xff] }
 0x1a0   : > { %v1748_v1 = vpop.f32.mrf.mxu0  ;;  %v1819_v2 = vpop.f32.mrf.mxu1  ;;  %2109 = vmatprep.subr.mxu0 %v1912_v50  ;;  %v1991_v46 = vld [vmem:[%s6015_s6 + $0x300] sm:$0xff] }
 0x1a1   : > { %v1823_v5 = vadd.f32 %v1748_v1, %v1659_v61  ;;  %v1825_v6 = vadd.f32 %v1819_v2, %v1661_v62  ;;  %2110 = vmatpush1.msra.mxu0 %v1911_v51  ;;  %v2051_v49 = vld [vmem:[%s6015_s6 + $0x4e0] sm:$0xff]  ;;  %v2048_v51 = vld [vmem:[%s6015_s6 + $0x4c8] sm:$0xff] }
 0x1a2   : > { %v1750_v8 = vpop.f32.mrf.mxu0  ;;  %v4626_v10 = vpop.f32.mrf.mxu1  ;;  %2111 = vmatprep.subr.mxu0 %v1908_v52  ;;  %v1987_v50 = vld [vmem:[%s6015_s6 + $0x2e0] sm:$0xff]  ;;  %v1984_v52 = vld [vmem:[%s6015_s6 + $0x2c8] sm:$0xff] }
 0x1a3   : > { %v5161_v11 = vadd.f32 %v1830_v63, %v1823_v5  ;;  %v5163_v12 = vadd.f32 %v1830_v63, %v1825_v6  ;;  %v1824_v13 = vadd.f32 %v1750_v8, %v1660_v4  ;;  %2112 = vmatpush1.msra.mxu0 %v1907_v53  ;;  %v2047_v53 = vld [vmem:[%s6015_s6 + $0x4c0] sm:$0xff] }
 0x1a4   : > { %2113 = vmatprep.subr.mxu0 %v1904_v54  ;;  %v1983_v54 = vld [vmem:[%s6015_s6 + $0x2c0] sm:$0xff] }
 0x1a5   : > { %v1835_v15 = vmax.f32 %v5161_v11, 0.0  ;;  %v5166_v16 = vadd.f32 %v1830_v63, %v1824_v13  ;;  %v1837_v19 = vmax.f32 %v5163_v12, 0.0  ;;  %2114 = vmatpush1.msra.mxu0 %v1903_v55  ;;  %v2020_v12 = vld [vmem:[%s6015_s6 + $0x3e8] sm:$0xff] }
 0x1a6   : > { %2115 = vmatprep.subr.mxu0 %v1900_v56  ;;  %v2044_v55 = vld [vmem:[%s6015_s6 + $0x4a8] sm:$0xff] }
 0x1a7   : > { %v1836_v20 = vmax.f32 %v5166_v16, 0.0  ;;  %v1855_v23 = vmul.f32 %v5170_v18, %v1835_v15  ;;  %v1857_v24 = vmul.f32 %v5174_v21, %v1837_v19  ;;  %2116 = vmatpush1.msra.mxu0 %v1899_v57  ;;  %v1980_v56 = vld [vmem:[%s6015_s6 + $0x2a8] sm:$0xff]  ;;  %v2043_v57 = vld [vmem:[%s6015_s6 + $0x4a0] sm:$0xff] }
 0x1a8   : > { %2117 = vmatprep.subr.mxu0 %v1896_v58  ;;  %v1979_v58 = vld [vmem:[%s6015_s6 + $0x2a0] sm:$0xff] }
 0x1a9   : > { %v1856_v22 = vmul.f32 %v5168_v17, %v1836_v20  ;;  %2118 = vmatpush1.msra.mxu0 %v1895_v59  ;;  %v2040_v59 = vld [vmem:[%s6015_s6 + $0x488] sm:$0xff] }
 0x1aa   : > { %2119 = vmatprep.subr.mxu0 %v2020_v12  ;;  %v1960_v12 = vld [vmem:[%s6015_s6 + $0x208] sm:$0xff] }
 0x1ab   : > { %v1858_v25 = vadd.f32 %v1856_v22, %v1855_v23  ;;  %v2015_v22 = vld [vmem:[%s6015_s6 + $0x3c0] sm:$0xff]  ;;  %v2076_v23 = vld [vmem:[%s6015_s6 + $0x5a8] sm:$0xff] }
 0x1ad   : > { %v1859_v26 = vadd.f32 %v1858_v25, %v1857_v24  ;;  %v2012_v24 = vld [vmem:[%s6015_s6 + $0x3a8] sm:$0xff]  ;;  %v2075_v25 = vld [vmem:[%s6015_s6 + $0x5a0] sm:$0xff] }
 0x1af   : > { %1860 = vadd.xlane.f32.xlu1 %v1859_v26  ;;  %v2011_v26 = vld [vmem:[%s6015_s6 + $0x3a0] sm:$0xff] }
 0x238   : > { %v1861_v60 = vpop.xlane.xlu1 %1860 }
 0x239   : > { %v1862_v61 = vrot.slane %v1861_v60, 4 }
 0x23b   : > { %v1863_v62 = vadd.f32 %v1862_v61, %v1861_v60  ;;  %v1976_v60 = vld [vmem:[%s6015_s6 + $0x288] sm:$0xff]  ;;  %v2039_v61 = vld [vmem:[%s6015_s6 + $0x480] sm:$0xff] }
 0x23d   : > { %v1864_v63 = vrot.slane %v1863_v62, 2 }
 0x23f   : > { %v1865_v1 = vadd.f32 %v1864_v63, %v1863_v62  ;;  %v1975_v62 = vld [vmem:[%s6015_s6 + $0x280] sm:$0xff]  ;;  %v2036_v63 = vld [vmem:[%s6015_s6 + $0x468] sm:$0xff] }
 0x241   : > { %v1866_v2 = vrot.slane %v1865_v1, 1 }
 0x243   : > { %v1867_v3 = vadd.f32 %v1866_v2, %v1865_v1  ;;  %v1972_v1 = vld [vmem:[%s6015_s6 + $0x268] sm:$0xff]  ;;  %v2035_v2 = vld [vmem:[%s6015_s6 + $0x460] sm:$0xff] }
 0x245   : > { %v1869_v4 = vmul.f32 0.00048828125, %v1867_v3  ;;  %v1971_v3 = vld [vmem:[%s6015_s6 + $0x260] sm:$0xff] }
 0x247   : > { %v5286_v5 = vsub.f32 %v1835_v15, %v1869_v4  ;;  %v5290_v6 = vsub.f32 %v1836_v20, %v1869_v4  ;;  %v5294_v7 = vsub.f32 %v1837_v19, %v1869_v4  ;;  %v2080_v19 = vld [vmem:[%s6015_s6 + $0x5c8] sm:$0xff] }
 0x248   : > { %v2016_v20 = vld [vmem:[%s6015_s6 + $0x3c8] sm:$0xff] }
 0x249   : > { %v1873_v8 = vmul.f32 %v5286_v5, %v5170_v18  ;;  %v1874_v9 = vmul.f32 %v5290_v6, %v5168_v17  ;;  %v1875_v10 = vmul.f32 %v5294_v7, %v5174_v21  ;;  %v2083_v18 = vld [vmem:[%s6015_s6 + $0x5e0] sm:$0xff]  ;;  %v2032_v4 = vld [vmem:[%s6015_s6 + $0x448] sm:$0xff] }
 0x24a   : > { %2159 = vmatpush1.msra.mxu1 %v2083_v18  ;;  %v2019_v17 = vld [vmem:[%s6015_s6 + $0x3e0] sm:$0xff] }
 0x24b   : > { %v1876_v11 = vmul.f32 %v1873_v8, %v1873_v8  ;;  %v1877_v13 = vmul.f32 %v1874_v9, %v1874_v9  ;;  %v1878_v14 = vmul.f32 %v1875_v10, %v1875_v10  ;;  %2120 = vmatpush2.msra.mxu0 %v2019_v17  ;;  %2160 = vmatprep.subr.mxu1 %v2080_v19  ;;  %v2079_v21 = vld [vmem:[%s6015_s6 + $0x5c0] sm:$0xff]  ;;  %v1968_v8 = vld [vmem:[%s6015_s6 + $0x248] sm:$0xff]  ;;  %v1958_v19 = vld [vmem:[%s6015_s6 + $0x1f8] sm:$0xff] }
 0x24c   : > { %2121 = vmatprep.subr.mxu0 %v2016_v20  ;;  %2161 = vmatpush1.msra.mxu1 %v2079_v21  ;;  %v2031_v9 = vld [vmem:[%s6015_s6 + $0x440] sm:$0xff]  ;;  %v2086_v20 = vld [vmem:[%s6015_s6 + $0x5f8] sm:$0xff] }
 0x24d   : > { %v1879_v15 = vadd.f32 %v1877_v13, %v1876_v11  ;;  %2122 = vmatpush2.msra.mxu0 %v2015_v22  ;;  %2162 = vmatprep.subr.mxu1 %v2076_v23  ;;  %v1967_v10 = vld [vmem:[%s6015_s6 + $0x240] sm:$0xff]  ;;  %v2028_v11 = vld [vmem:[%s6015_s6 + $0x428] sm:$0xff] }
 0x24e   : > { %2123 = vmatprep.subr.mxu0 %v2012_v24  ;;  %2163 = vmatpush1.msra.mxu1 %v2075_v25  ;;  %v1964_v13 = vld [vmem:[%s6015_s6 + $0x228] sm:$0xff]  ;;  %v2023_v18 = vld [vmem:[%s6015_s6 + $0x400] sm:$0xff] }
 0x24f   : > { %v1880_v16 = vadd.f32 %v1879_v15, %v1878_v14  ;;  %2124 = vmatpush2.msra.mxu0 %v2011_v26  ;;  %2164 = vmatprep.subr.mxu1 %v2072_v27  ;;  %v2027_v14 = vld [vmem:[%s6015_s6 + $0x420] sm:$0xff] }
 0x250   : > { %2125 = vmatprep.subr.mxu0 %v2008_v28  ;;  %2165 = vmatpush1.msra.mxu1 %v2071_v29  ;;  %v1963_v15 = vld [vmem:[%s6015_s6 + $0x220] sm:$0xff] }
 0x251   : > { %1881 = vadd.xlane.f32.xlu0 %v1880_v16  ;;  %2126 = vmatpush2.msra.mxu0 %v2007_v30  ;;  %v2024_v16 = vld [vmem:[%s6015_s6 + $0x408] sm:$0xff]  ;;  %v1959_v17 = vld [vmem:[%s6015_s6 + $0x200] sm:$0xff] }
 0x252   : > { %2166 = vmatprep.subr.mxu1 %v2068_v31  ;;  %2127 = vmatprep.subr.mxu0 %v2004_v32 }
 0x253   : > { %2167 = vmatpush1.msra.mxu1 %v2067_v33  ;;  %2128 = vmatpush2.msra.mxu0 %v2003_v34  ;;  %v1957_v33 = vld [vmem:[%s6015_s6 + $0x1f0] sm:$0xff] }
 0x254   : > { %2168 = vmatprep.subr.mxu1 %v2064_v35  ;;  %2129 = vmatprep.subr.mxu0 %v2000_v36  ;;  %v1954_v35 = vld [vmem:[%s6015_s6 + $0x1d8] sm:$0xff] }
 0x255   : > { %2169 = vmatpush1.msra.mxu1 %v2063_v37  ;;  %2130 = vmatpush2.msra.mxu0 %v1999_v38  ;;  %v1950_v36 = vld [vmem:[%s6015_s6 + $0x1b8] sm:$0xff]  ;;  %v2081_v37 = vld [vmem:[%s6015_s6 + $0x5d0] sm:$0xff] }
 0x256   : > { %2170 = vmatprep.subr.mxu1 %v2060_v39  ;;  %2131 = vmatprep.subr.mxu0 %v1996_v40  ;;  %v1949_v38 = vld [vmem:[%s6015_s6 + $0x1b0] sm:$0xff]  ;;  %v2078_v39 = vld [vmem:[%s6015_s6 + $0x5b8] sm:$0xff] }
 0x257   : > { %2171 = vmatpush1.msra.mxu1 %v2059_v41  ;;  %2132 = vmatpush2.msra.mxu0 %v1995_v42  ;;  %v1946_v40 = vld [vmem:[%s6015_s6 + $0x198] sm:$0xff]  ;;  %v2077_v41 = vld [vmem:[%s6015_s6 + $0x5b0] sm:$0xff] }
 0x258   : > { %2172 = vmatprep.subr.mxu1 %v2056_v43  ;;  %2133 = vmatprep.subr.mxu0 %v1992_v44  ;;  %v1945_v42 = vld [vmem:[%s6015_s6 + $0x190] sm:$0xff]  ;;  %v2074_v43 = vld [vmem:[%s6015_s6 + $0x598] sm:$0xff] }
 0x259   : > { %2173 = vmatpush1.msra.mxu1 %v2055_v45  ;;  %2134 = vmatpush2.msra.mxu0 %v1991_v46  ;;  %v1942_v44 = vld [vmem:[%s6015_s6 + $0x178] sm:$0xff]  ;;  %v2073_v45 = vld [vmem:[%s6015_s6 + $0x590] sm:$0xff] }
 0x25a   : > { %2174 = vmatprep.subr.mxu1 %v2052_v47  ;;  %2135 = vmatprep.subr.mxu0 %v1988_v48  ;;  %v1941_v46 = vld [vmem:[%s6015_s6 + $0x170] sm:$0xff]  ;;  %v2070_v47 = vld [vmem:[%s6015_s6 + $0x578] sm:$0xff] }
 0x25b   : > { %2175 = vmatpush1.msra.mxu1 %v2051_v49  ;;  %2136 = vmatpush2.msra.mxu0 %v1987_v50  ;;  %v1938_v48 = vld [vmem:[%s6015_s6 + $0x158] sm:$0xff]  ;;  %v2069_v49 = vld [vmem:[%s6015_s6 + $0x570] sm:$0xff] }
 0x25c   : > { %2176 = vmatprep.subr.mxu1 %v2048_v51  ;;  %2137 = vmatprep.subr.mxu0 %v1984_v52  ;;  %v1937_v50 = vld [vmem:[%s6015_s6 + $0x150] sm:$0xff]  ;;  %v2066_v51 = vld [vmem:[%s6015_s6 + $0x558] sm:$0xff] }
 0x25d   : > { %2177 = vmatpush1.msra.mxu1 %v2047_v53  ;;  %2138 = vmatpush2.msra.mxu0 %v1983_v54  ;;  %v1934_v52 = vld [vmem:[%s6015_s6 + $0x138] sm:$0xff]  ;;  %v2065_v53 = vld [vmem:[%s6015_s6 + $0x550] sm:$0xff] }
 0x25e   : > { %2178 = vmatprep.subr.mxu1 %v2044_v55  ;;  %2139 = vmatprep.subr.mxu0 %v1980_v56  ;;  %v1933_v54 = vld [vmem:[%s6015_s6 + $0x130] sm:$0xff]  ;;  %v2062_v55 = vld [vmem:[%s6015_s6 + $0x538] sm:$0xff] }
 0x25f   : > { %2179 = vmatpush1.msra.mxu1 %v2043_v57  ;;  %2140 = vmatpush2.msra.mxu0 %v1979_v58  ;;  %v1930_v56 = vld [vmem:[%s6015_s6 + $0x118] sm:$0xff]  ;;  %v2061_v57 = vld [vmem:[%s6015_s6 + $0x530] sm:$0xff] }
 0x260   : > { %2180 = vmatprep.subr.mxu1 %v2040_v59  ;;  %2141 = vmatprep.subr.mxu0 %v1976_v60  ;;  %v1929_v58 = vld [vmem:[%s6015_s6 + $0x110] sm:$0xff]  ;;  %v2058_v59 = vld [vmem:[%s6015_s6 + $0x518] sm:$0xff] }
 0x261   : > { %2181 = vmatpush1.msra.mxu1 %v2039_v61  ;;  %2142 = vmatpush2.msra.mxu0 %v1975_v62  ;;  %v1926_v60 = vld [vmem:[%s6015_s6 + $0xf8] sm:$0xff]  ;;  %v2057_v61 = vld [vmem:[%s6015_s6 + $0x510] sm:$0xff] }
 0x262   : > { %2182 = vmatprep.subr.mxu1 %v2036_v63  ;;  %2143 = vmatprep.subr.mxu0 %v1972_v1  ;;  %v1925_v62 = vld [vmem:[%s6015_s6 + $0xf0] sm:$0xff]  ;;  %v2054_v63 = vld [vmem:[%s6015_s6 + $0x4f8] sm:$0xff] }
 0x263   : > { %2183 = vmatpush1.msra.mxu1 %v2035_v2  ;;  %2144 = vmatpush2.msra.mxu0 %v1971_v3  ;;  %v1922_v1 = vld [vmem:[%s6015_s6 + $0xd8] sm:$0xff]  ;;  %v2053_v2 = vld [vmem:[%s6015_s6 + $0x4f0] sm:$0xff] }
 0x264   : > { %2184 = vmatprep.subr.mxu1 %v2032_v4  ;;  %2145 = vmatprep.subr.mxu0 %v1968_v8  ;;  %v1921_v3 = vld [vmem:[%s6015_s6 + $0xd0] sm:$0xff]  ;;  %v2050_v4 = vld [vmem:[%s6015_s6 + $0x4d8] sm:$0xff] }
 0x265   : > { %2185 = vmatpush1.msra.mxu1 %v2031_v9  ;;  %2146 = vmatpush2.msra.mxu0 %v1967_v10  ;;  %v1918_v8 = vld [vmem:[%s6015_s6 + $0xb8] sm:$0xff]  ;;  %v2049_v9 = vld [vmem:[%s6015_s6 + $0x4d0] sm:$0xff] }
 0x266   : > { %2186 = vmatprep.subr.mxu1 %v2028_v11  ;;  %2147 = vmatprep.subr.mxu0 %v1964_v13  ;;  %v1917_v10 = vld [vmem:[%s6015_s6 + $0xb0] sm:$0xff]  ;;  %v2046_v11 = vld [vmem:[%s6015_s6 + $0x4b8] sm:$0xff] }
 0x267   : > { %2187 = vmatpush1.msra.mxu1 %v2027_v14  ;;  %2148 = vmatpush2.msra.mxu0 %v1963_v15  ;;  %v1914_v13 = vld [vmem:[%s6015_s6 + $0x98] sm:$0xff]  ;;  %v2045_v14 = vld [vmem:[%s6015_s6 + $0x4b0] sm:$0xff] }
 0x268   : > { %2188 = vmatprep.subr.mxu1 %v2024_v16  ;;  %2149 = vmatprep.subr.mxu0 %v1960_v12  ;;  %v1913_v15 = vld [vmem:[%s6015_s6 + $0x90] sm:$0xff]  ;;  %v2042_v16 = vld [vmem:[%s6015_s6 + $0x498] sm:$0xff] }
 0x269   : > { %2189 = vmatpush1.msra.mxu1 %v2023_v18  ;;  %2150 = vmatpush2.msra.mxu0 %v1959_v17  ;;  %v1910_v12 = vld [vmem:[%s6015_s6 + $0x78] sm:$0xff]  ;;  %v2041_v18 = vld [vmem:[%s6015_s6 + $0x490] sm:$0xff] }
 0x26a   : > { %2229 = vmatprep.subr.mxu1 %v1958_v19  ;;  %2300 = vmatprep.subr.mxu0 %v2086_v20  ;;  %v1909_v17 = vld [vmem:[%s6015_s6 + $0x70] sm:$0xff]  ;;  %v2038_v19 = vld [vmem:[%s6015_s6 + $0x478] sm:$0xff] }
 0x26b   : > { %v1906_v20 = vld [vmem:[%s6015_s6 + $0x58] sm:$0xff] }
 0x2da   : > { %v1882_v21 = vpop.xlane.xlu0 %1881 }
 0x2db   : > { %v1883_v22 = vrot.slane %v1882_v21, 4 }
 0x2dd   : > { %v1884_v23 = vadd.f32 %v1883_v22, %v1882_v21  ;;  %v2037_v21 = vld [vmem:[%s6015_s6 + $0x470] sm:$0xff] }
 0x2de   : > { %v1905_v22 = vld [vmem:[%s6015_s6 + $0x50] sm:$0xff] }
 0x2df   : > { %v1885_v24 = vrot.slane %v1884_v23, 2 }
 0x2e1   : > { %v1886_v25 = vadd.f32 %v1885_v24, %v1884_v23  ;;  %v2034_v23 = vld [vmem:[%s6015_s6 + $0x458] sm:$0xff] }
 0x2e2   : > { %v1902_v24 = vld [vmem:[%s6015_s6 + $0x38] sm:$0xff] }
 0x2e3   : > { %v1887_v26 = vrot.slane %v1886_v25, 1 }
 0x2e5   : > { %v1888_v27 = vadd.f32 %v1887_v26, %v1886_v25  ;;  %v2033_v25 = vld [vmem:[%s6015_s6 + $0x450] sm:$0xff] }
 0x2e6   : > { %v1901_v26 = vld [vmem:[%s6015_s6 + $0x30] sm:$0xff] }
 0x2e7   : > { %v1889_v28 = vmul.f32 0.00048828125, %v1888_v27  ;;  %v2030_v27 = vld [vmem:[%s6015_s6 + $0x438] sm:$0xff] }
 0x2e9   : > { %v1890_v29 = vadd.f32 1e-05, %v1889_v28  ;;  %v1898_v28 = vld [vmem:[%s6015_s6 + $0x18] sm:$0xff] }
 0x2eb   : > { %4786 = vrsqrt.f32 %v1890_v29  ;;  %v2029_v29 = vld [vmem:[%s6015_s6 + $0x430] sm:$0xff] }
 0x2f8   : > { %v4787_v30 = vpop.eup %4786 }
 0x2f9   : > { %v1893_v31 = vmul.f32 %v4787_v30, %v5290_v6  ;;  %v5499_v32 = vmul.f32 %v4787_v30, %v5294_v7  ;;  %v5505_v34 = vmul.f32 %v4787_v30, %v5286_v5  ;;  %v2085_v6 = vld [vmem:[%s6015_s6 + $0x5f0] sm:$0xff]  ;;  %v2082_v5 = vld [vmem:[%s6015_s6 + $0x5d8] sm:$0xff] }
 0x2fa   : > { %v1953_v7 = vld [vmem:[%s6015_s6 + $0x1d0] sm:$0xff] }
 0x2fb   : > { %2151 = vmatprep.mubr.f32.mxu0 %v1893_v31  ;;  %2223 = vmatmul.mubr.f32.vlgmr.msra.gmra.mxu1 %v5499_v32  ;;  %v1897_v30 = vld [vmem:[%s6015_s6 + $0x10] sm:$0xff] }
 0x2fc   : > { %2230 = vmatpush1.msra.mxu1 %v1957_v33  ;;  %2152 = vmatmul.mubr.f32.vlgmr.msra.gmra.mxu0 %v5505_v34  ;;  %v2022_v33 = vld [vmem:[%s6015_s6 + $0x3f8] sm:$0xff] }
 0x2fd   : > { %2231 = vmatprep.subr.mxu1 %v1954_v35  ;;  %2293 = vmatprep.mubr.f32.mxu1 %v1893_v31  ;;  %v2026_v31 = vld [vmem:[%s6015_s6 + $0x418] sm:$0xff]  ;;  %v2025_v35 = vld [vmem:[%s6015_s6 + $0x410] sm:$0xff] }
 0x2fe   : > { %2301 = vmatpush1.msra.mxu0 %v2085_v6  ;;  %2232 = vmatpush1.msra.mxu1 %v1953_v7  ;;  %v2021_v6 = vld [vmem:[%s6015_s6 + $0x3f0] sm:$0xff]  ;;  %v2018_v7 = vld [vmem:[%s6015_s6 + $0x3d8] sm:$0xff] }
 0x2ff   : > { %2302 = vmatprep.subr.mxu0 %v2082_v5  ;;  %2233 = vmatprep.subr.mxu1 %v1950_v36  ;;  %v2017_v5 = vld [vmem:[%s6015_s6 + $0x3d0] sm:$0xff]  ;;  %v2014_v36 = vld [vmem:[%s6015_s6 + $0x3b8] sm:$0xff] }
 0x300   : > { %2303 = vmatpush1.msra.mxu0 %v2081_v37  ;;  %2234 = vmatpush1.msra.mxu1 %v1949_v38  ;;  %v2013_v37 = vld [vmem:[%s6015_s6 + $0x3b0] sm:$0xff]  ;;  %v2010_v38 = vld [vmem:[%s6015_s6 + $0x398] sm:$0xff] }
 0x301   : > { %2304 = vmatprep.subr.mxu0 %v2078_v39  ;;  %2235 = vmatprep.subr.mxu1 %v1946_v40  ;;  %v2009_v39 = vld [vmem:[%s6015_s6 + $0x390] sm:$0xff] }
 0x302   : > { %2305 = vmatpush1.msra.mxu0 %v2077_v41  ;;  %2236 = vmatpush1.msra.mxu1 %v1945_v42  ;;  %v2005_v40 = vld [vmem:[%s6015_s6 + $0x370] sm:$0xff]  ;;  %v2002_v41 = vld [vmem:[%s6015_s6 + $0x358] sm:$0xff] }
 0x303   : > { %2306 = vmatprep.subr.mxu0 %v2074_v43  ;;  %2237 = vmatprep.subr.mxu1 %v1942_v44  ;;  %v2001_v42 = vld [vmem:[%s6015_s6 + $0x350] sm:$0xff]  ;;  %v1998_v43 = vld [vmem:[%s6015_s6 + $0x338] sm:$0xff] }
 0x304   : > { %2307 = vmatpush1.msra.mxu0 %v2073_v45  ;;  %2238 = vmatpush1.msra.mxu1 %v1941_v46  ;;  %v1997_v44 = vld [vmem:[%s6015_s6 + $0x330] sm:$0xff]  ;;  %v1994_v45 = vld [vmem:[%s6015_s6 + $0x318] sm:$0xff] }
 0x305   : > { %2308 = vmatprep.subr.mxu0 %v2070_v47  ;;  %2239 = vmatprep.subr.mxu1 %v1938_v48  ;;  %v1993_v46 = vld [vmem:[%s6015_s6 + $0x310] sm:$0xff]  ;;  %v1990_v47 = vld [vmem:[%s6015_s6 + $0x2f8] sm:$0xff] }
 0x306   : > { %2309 = vmatpush1.msra.mxu0 %v2069_v49  ;;  %2240 = vmatpush1.msra.mxu1 %v1937_v50  ;;  %v1989_v48 = vld [vmem:[%s6015_s6 + $0x2f0] sm:$0xff]  ;;  %v1986_v49 = vld [vmem:[%s6015_s6 + $0x2d8] sm:$0xff] }
 0x307   : > { %2310 = vmatprep.subr.mxu0 %v2066_v51  ;;  %2241 = vmatprep.subr.mxu1 %v1934_v52  ;;  %v1985_v50 = vld [vmem:[%s6015_s6 + $0x2d0] sm:$0xff]  ;;  %v1982_v51 = vld [vmem:[%s6015_s6 + $0x2b8] sm:$0xff] }
 0x308   : > { %2311 = vmatpush1.msra.mxu0 %v2065_v53  ;;  %2242 = vmatpush1.msra.mxu1 %v1933_v54  ;;  %v1981_v52 = vld [vmem:[%s6015_s6 + $0x2b0] sm:$0xff]  ;;  %v1978_v53 = vld [vmem:[%s6015_s6 + $0x298] sm:$0xff] }
 0x309   : > { %2312 = vmatprep.subr.mxu0 %v2062_v55  ;;  %2243 = vmatprep.subr.mxu1 %v1930_v56  ;;  %v1977_v54 = vld [vmem:[%s6015_s6 + $0x290] sm:$0xff]  ;;  %v1974_v55 = vld [vmem:[%s6015_s6 + $0x278] sm:$0xff] }
 0x30a   : > { %2313 = vmatpush1.msra.mxu0 %v2061_v57  ;;  %2244 = vmatpush1.msra.mxu1 %v1929_v58  ;;  %v1973_v56 = vld [vmem:[%s6015_s6 + $0x270] sm:$0xff]  ;;  %v1970_v57 = vld [vmem:[%s6015_s6 + $0x258] sm:$0xff] }
 0x30b   : > { %2314 = vmatprep.subr.mxu0 %v2058_v59  ;;  %2245 = vmatprep.subr.mxu1 %v1926_v60  ;;  %v1969_v58 = vld [vmem:[%s6015_s6 + $0x250] sm:$0xff]  ;;  %v1966_v59 = vld [vmem:[%s6015_s6 + $0x238] sm:$0xff] }
 0x30c   : > { %2315 = vmatpush1.msra.mxu0 %v2057_v61  ;;  %2246 = vmatpush1.msra.mxu1 %v1925_v62  ;;  %v1965_v60 = vld [vmem:[%s6015_s6 + $0x230] sm:$0xff]  ;;  %v1962_v61 = vld [vmem:[%s6015_s6 + $0x218] sm:$0xff] }
 0x30d   : > { %2316 = vmatprep.subr.mxu0 %v2054_v63  ;;  %2247 = vmatprep.subr.mxu1 %v1922_v1  ;;  %v1961_v62 = vld [vmem:[%s6015_s6 + $0x210] sm:$0xff] }
 0x30e   : > { %2317 = vmatpush1.msra.mxu0 %v2053_v2  ;;  %2248 = vmatpush1.msra.mxu1 %v1921_v3 }
 0x30f   : > { %2318 = vmatprep.subr.mxu0 %v2050_v4  ;;  %2249 = vmatprep.subr.mxu1 %v1918_v8 }
 0x310   : > { %2319 = vmatpush1.msra.mxu0 %v2049_v9  ;;  %2250 = vmatpush1.msra.mxu1 %v1917_v10 }
 0x311   : > { %2320 = vmatprep.subr.mxu0 %v2046_v11  ;;  %2251 = vmatprep.subr.mxu1 %v1914_v13 }
 0x312   : > { %2321 = vmatpush1.msra.mxu0 %v2045_v14  ;;  %2252 = vmatpush1.msra.mxu1 %v1913_v15  ;;  %v5810_v15 = vld [vmem:[%s6012_s3 + $0x8] sm:$0xff] }
 0x313   : > { %2322 = vmatprep.subr.mxu0 %v2042_v16  ;;  %2253 = vmatprep.subr.mxu1 %v1910_v12  ;;  %v5828_v12 = vld [vmem:[%s6012_s3 + $0x30] sm:$0xff] }
 0x314   : > { %2323 = vmatpush1.msra.mxu0 %v2041_v18  ;;  %2254 = vmatpush1.msra.mxu1 %v1909_v17  ;;  %v4025_v18 = vld [vmem:[%s6013_s4] sm:$0xff] }
 0x315   : > { %2324 = vmatprep.subr.mxu0 %v2038_v19  ;;  %2255 = vmatprep.subr.mxu1 %v1906_v20 }
 0x316   : > { %2325 = vmatpush1.msra.mxu0 %v2037_v21  ;;  %2256 = vmatpush1.msra.mxu1 %v1905_v22  ;;  %v4407_v22 = vld [vmem:[%s6012_s3 + $0x10] sm:$0xff] }
 0x317   : > { %2326 = vmatprep.subr.mxu0 %v2034_v23  ;;  %2257 = vmatprep.subr.mxu1 %v1902_v24 }
 0x318   : > { %2327 = vmatpush1.msra.mxu0 %v2033_v25  ;;  %2258 = vmatpush1.msra.mxu1 %v1901_v26 }
 0x319   : > { %2328 = vmatprep.subr.mxu0 %v2030_v27  ;;  %2259 = vmatprep.subr.mxu1 %v1898_v28  ;;  %v4408_v27 = vld [vmem:[%s6012_s3 + $0x18] sm:$0xff] }
 0x31a   : > { %2329 = vmatpush1.msra.mxu0 %v2029_v29  ;;  %2260 = vmatpush1.msra.mxu1 %v1897_v30 }
 0x31b   : > { %2330 = vmatprep.subr.mxu0 %v2026_v31  ;;  %2261 = vmatprep.subr.mxu1 %v2022_v33 }
 0x31c   : > { %2331 = vmatpush1.msra.mxu0 %v2025_v35  ;;  %2364 = vmatprep.mubr.f32.mxu0 %v4864_v0 }
 0x31d   : > { %2262 = vmatpush2.msra.mxu1 %v2021_v6  ;;  %2365 = vmatmul.mubr.f32.vlgmr.msra.gmra.mxu0 %v5499_v32  ;;  %v2006_v32 = vld [vmem:[%s6015_s6 + $0x378] sm:$0xff] }
 0x31e   : > { %2263 = vmatprep.subr.mxu1 %v2018_v7 }
 0x31f   : > { %2264 = vmatpush2.msra.mxu1 %v2017_v5 }
 0x320   : > { %2265 = vmatprep.subr.mxu1 %v2014_v36 }
 0x321   : > { %2266 = vmatpush2.msra.mxu1 %v2013_v37  ;;  %v4417_v37 = vld [vmem:[%s6012_s3 + $0x20] sm:$0xff] }
 0x322   : > { %2267 = vmatprep.subr.mxu1 %v2010_v38 }
 0x323   : > { %2268 = vmatpush2.msra.mxu1 %v2009_v39 }
 0x324   : > { %2269 = vmatprep.subr.mxu1 %v2006_v32 }
 0x325   : > { %2270 = vmatpush2.msra.mxu1 %v2005_v40 }
 0x326   : > { %2271 = vmatprep.subr.mxu1 %v2002_v41  ;;  %v4418_v41 = vld [vmem:[%s6012_s3 + $0x28] sm:$0xff] }
 0x327   : > { %2272 = vmatpush2.msra.mxu1 %v2001_v42 }
 0x328   : > { %2273 = vmatprep.subr.mxu1 %v1998_v43 }
 0x329   : > { %2274 = vmatpush2.msra.mxu1 %v1997_v44  ;;  %v4424_v44 = vld [vmem:[%s6012_s3 + $0x38] sm:$0xff] }
 0x32a   : > { %2275 = vmatprep.subr.mxu1 %v1994_v45 }
 0x32b   : > { %2276 = vmatpush2.msra.mxu1 %v1993_v46 }
 0x32c   : > { %2277 = vmatprep.subr.mxu1 %v1990_v47 }
 0x32d   : > { %2278 = vmatpush2.msra.mxu1 %v1989_v48 }
 0x32e   : > { %2279 = vmatprep.subr.mxu1 %v1986_v49  ;;  %v4429_v49 = vld [vmem:[%s6012_s3 + $0x40] sm:$0xff] }
 0x32f   : > { %2280 = vmatpush2.msra.mxu1 %v1985_v50 }
 0x330   : > { %2281 = vmatprep.subr.mxu1 %v1982_v51 }
 0x331   : > { %2282 = vmatpush2.msra.mxu1 %v1981_v52 }
 0x332   : > { %2283 = vmatprep.subr.mxu1 %v1978_v53 }
 0x333   : > { %2284 = vmatpush2.msra.mxu1 %v1977_v54  ;;  %v4430_v54 = vld [vmem:[%s6012_s3 + $0x48] sm:$0xff] }
 0x334   : > { %2285 = vmatprep.subr.mxu1 %v1974_v55 }
 0x335   : > { %2286 = vmatpush2.msra.mxu1 %v1973_v56  ;;  %v4435_v56 = vld [vmem:[%s6012_s3 + $0x50] sm:$0xff] }
 0x336   : > { %2287 = vmatprep.subr.mxu1 %v1970_v57 }
 0x337   : > { %2288 = vmatpush2.msra.mxu1 %v1969_v58 }
 0x338   : > { %2289 = vmatprep.subr.mxu1 %v1966_v59 }
 0x339   : > { %2290 = vmatpush2.msra.mxu1 %v1965_v60  ;;  %v4436_v60 = vld [vmem:[%s6012_s3 + $0x58] sm:$0xff] }
 0x33a   : > { %2291 = vmatprep.subr.mxu1 %v1962_v61 }
 0x33b   : > { %2292 = vmatpush2.msra.mxu1 %v1961_v62 }
 0x33c   : > { %2294 = vmatmul.mubr.f32.vlgmr.msra.gmra.mxu1 %v5505_v34  ;;  %v5803_v34 = vld [vmem:[%s6012_s3] sm:$0xff] }
 0x33d   : > { %2464 = vmatprep.mubr.f32.mxu1 %v4864_v0  ;;  %4634 = vmatprep.mubr.msk.f32.mxu0 %vm389_vm2, %v5803_v34 }
 0x3bb   : > { %v2224_v63 = vpop.f32.mrf.mxu1 }
 0x3bc   : > { %v2153_v1 = vpop.f32.mrf.mxu0 }
 0x3bd   : > { %v2226_v2 = vpop.f32.mrf.mxu1  ;;  %v5796_v8 = vadd.f32 %v2224_v63, %v2153_v1 }
 0x3be   : > { %v2155_v3 = vpop.f32.mrf.mxu0 }
 0x3bf   : > { %v5792_v4 = vadd.f32 %v2226_v2, %v2155_v3  ;;  %v4441_v2 = vld [vmem:[%s6012_s3 + $0x60] sm:$0xff] }
 0x3c1   : > { %2382 = vrot.lane.b32.xlu1 %v5792_v4, %s4866_s29 }
 0x3c5   : > { %2380 = vrot.lane.b32.xlu1 %v5796_v8, %s4866_s29 }
 0x3dd   : > { %v2366_v9 = vpop.f32.mrf.mxu0 }
 0x3df   : > { %v2368_v13 = vpop.f32.mrf.mxu0 }
 0x3fc   : > { %v2295_v10 = vpop.f32.mrf.mxu1 }
 0x3fd   : > { %v2367_v11 = vadd.f32 %v2366_v9, %v2295_v10 }
 0x3fe   : > { %v2297_v14 = vpop.f32.mrf.mxu1 }
 0x3ff   : > { %v2369_v16 = vadd.f32 %v2368_v13, %v2297_v14  ;;  %2384 = vrot.lane.b32.xlu0 %v2367_v11, %s4866_s29  ;;  %4632 = vmatprep.subr.mxu0 %v2367_v11 }
 0x400   : > { %4633 = vmatpush3.msra.mxu0 %v2367_v11 }
 0x401   : > { %2386 = vrot.lane.b32.xlu1 %v2369_v16, %s4866_s29  ;;  %4635 = vmatmul.mubr.msk.f32.vlgmr.msra.gmra.mxu0 %vm389_vm2, %v5810_v15  ;;  %s362_s29 = scalar_lea.vmem %s6018_s9, %s4462_s19 }
 0x402   : > { %4644 = vmatprep.mubr.msk.f32.mxu0 %vm389_vm2, %v5828_v12 }
 0x403   : > { %2715 = vrot.lane.b32.xlu0 %v5792_v4, %s4867_s11 }
 0x405   : > { %2717 = vrot.lane.b32.xlu1 %v2367_v11, %s4867_s11 }
 0x407   : > { %2713 = vrot.lane.b32.xlu0 %v5796_v8, %s4867_s11 }
 0x409   : > { %2894 = vrot.lane.b32.xlu1 %v5796_v8, %s4868_s12 }
 0x40b   : > { %2898 = vrot.lane.b32.xlu0 %v2367_v11, %s4868_s12 }
 0x40d   : > { %3079 = vrot.lane.b32.xlu1 %v2367_v11, %s4869_s13 }
 0x40f   : > { %2896 = vrot.lane.b32.xlu0 %v5792_v4, %s4868_s12 }
 0x411   : > { %3256 = vrot.lane.b32.xlu1 %v5796_v8, %s4870_s14 }
 0x413   : > { %3077 = vrot.lane.b32.xlu0 %v5792_v4, %s4869_s13 }
 0x415   : > { %2719 = vrot.lane.b32.xlu1 %v2369_v16, %s4867_s11 }
 0x417   : > { %3075 = vrot.lane.b32.xlu0 %v5796_v8, %s4869_s13 }
 0x419   : > { %2900 = vrot.lane.b32.xlu1 %v2369_v16, %s4868_s12 }
 0x41b   : > { %3260 = vrot.lane.b32.xlu0 %v2367_v11, %s4870_s14 }
 0x41d   : > { %3441 = vrot.lane.b32.xlu1 %v2367_v11, %s4871_s15 }
 0x41f   : > { %3258 = vrot.lane.b32.xlu0 %v5792_v4, %s4870_s14 }
 0x421   : > { %3081 = vrot.lane.b32.xlu1 %v2369_v16, %s4869_s13 }
 0x423   : > { %3439 = vrot.lane.b32.xlu0 %v5792_v4, %s4871_s15 }
 0x425   : > { %3262 = vrot.lane.b32.xlu1 %v2369_v16, %s4870_s14 }
 0x427   : > { %3437 = vrot.lane.b32.xlu0 %v5796_v8, %s4871_s15 }
 0x429   : > { %3618 = vrot.lane.b32.xlu1 %v5796_v8, %s4872_s16 }
 0x42b   : > { %3622 = vrot.lane.b32.xlu0 %v2367_v11, %s4872_s16 }
 0x42d   : > { %3443 = vrot.lane.b32.xlu1 %v2369_v16, %s4871_s15 }
 0x42f   : > { %3620 = vrot.lane.b32.xlu0 %v5792_v4, %s4872_s16 }
 0x431   : > { %3624 = vrot.lane.b32.xlu1 %v2369_v16, %s4872_s16 }
 0x433   : > { %3801 = vrot.lane.b32.xlu0 %v5792_v4, %s4874_s17  ;;  %v2383_v17 = vpop.permute.xlu1 %2382 }
 0x435   : > { %3803 = vrot.lane.b32.xlu1 %v2367_v11, %s4874_s17  ;;  %v4447_v11 = vld [vmem:[%s6012_s3 + $0x70] sm:$0xff] }
 0x437   : > { %3799 = vrot.lane.b32.xlu0 %v5796_v8, %s4874_s17  ;;  %v2381_v19 = vpop.permute.xlu1 %2380 }
 0x438   : > { %v2388_v23 = vsel %vm382_vm1, %v2381_v19, %v2383_v17 }
 0x439   : > { %3805 = vrot.lane.b32.xlu1 %v2369_v16, %s4874_s17  ;;  %v4448_v16 = vld [vmem:[%s6012_s3 + $0x78] sm:$0xff] }
 0x43b   : > { %4029 = vperm.xlu0 %4784, %v4025_v18  }
 0x471   : > { %v2385_v20 = vpop.permute.xlu0 %2384 }
 0x472   : > { %v2389_v21 = vsel %vm382_vm1, %v2383_v17, %v2385_v20 }
 0x473   : > { %2430 = vmatprep.subr.mxu1 %v2389_v21  ;;  %v2387_v24 = vpop.permute.xlu1 %2386  ;;  %v4453_v21 = vld [vmem:[%s6012_s3 + $0x80] sm:$0xff] }
 0x474   : > { %2431 = vmatpush1.msra.mxu1 %v2388_v23  ;;  %v2390_v25 = vsel %vm382_vm1, %v2385_v20, %v2387_v24 }
 0x475   : > { %v2716_v26 = vpop.permute.xlu0 %2715  ;;  %4409 = vmatmul.mubr.msk.f32.vlgmr.msra.gmra.mxu1 %vm389_vm2, %v4407_v22  ;;  %4627 = vmatprep.subr.mxu1 %v2390_v25 }
 0x476   : > { %4628 = vmatpush3.msra.mxu1 %v2390_v25  ;;  %2470 = vmatprep.mubr.f32.mxu1 %v4864_v0  ;;  %v4454_v25 = vld [vmem:[%s6012_s3 + $0x88] sm:$0xff] }
 0x477   : > { %2588 = vmatprep.subr.mxu1 %v5792_v4  ;;  %v2718_v28 = vpop.permute.xlu1 %2717 }
 0x478   : > { %v2722_v33 = vsel %vm688_vm3, %v2716_v26, %v2718_v28 }
 0x479   : > { %v2714_v29 = vpop.permute.xlu0 %2713  ;;  %4410 = vmatmul.mubr.msk.f32.gmra.mxu1 %vm389_vm2, %v4408_v27 }
 0x47a   : > { %4629 = vmatprep.mubr.msk.f32.mxu1 %vm389_vm2, %v4407_v22  ;;  %v2721_v6 = vsel %vm688_vm3, %v2714_v29, %v2716_v26  ;;  %v4008_v26 = vld [vmem:[#allocation2 + $0xf8] sm:$0xff]  ;;  %v3991_v29 = vld [vmem:[#allocation2 + $0x70] sm:$0xff] }
 0x47b   : > { %v2895_v30 = vpop.permute.xlu1 %2894 }
 0x47d   : > { %v2899_v31 = vpop.permute.xlu0 %2898  ;;  %4630 = vmatmul.mubr.msk.f32.vlgmr.msra.gmra.mxu1 %vm389_vm2, %v4408_v27  ;;  %v3992_v27 = vld [vmem:[#allocation2 + $0x78] sm:$0xff] }
 0x47e   : > { %2589 = vmatpush1.msra.mxu1 %v5796_v8  ;;  %2622 = vmatprep.mubr.f32.mxu1 %v4864_v0 }
 0x47f   : > { %2763 = vmatprep.subr.mxu1 %v2722_v33  ;;  %v3080_v35 = vpop.permute.xlu1 %3079  ;;  %v4024_v33 = vld [vmem:[#allocation2 + $0x178] sm:$0xff] }
 0x481   : > { %v2897_v7 = vpop.permute.xlu0 %2896  ;;  %4413 = vmatmul.mubr.msk.f32.vlgmr.msra.gmra.mxu1 %vm389_vm2, %v5803_v34  ;;  %v4442_v34 = vld [vmem:[%s6012_s3 + $0x68] sm:$0xff] }
 0x482   : > { %2764 = vmatpush1.msra.mxu1 %v2721_v6  ;;  %2628 = vmatprep.mubr.f32.mxu1 %v4864_v0  ;;  %v2903_v40 = vsel %vm852_vm4, %v2897_v7, %v2899_v31  ;;  %v2902_v50 = vsel %vm852_vm4, %v2895_v30, %v2897_v7  ;;  %v4006_v30 = vld [vmem:[#allocation2 + $0xe8] sm:$0xff]  ;;  %v4004_v6 = vld [vmem:[#allocation2 + $0xd8] sm:$0xff]  ;;  %v4023_v7 = vld [vmem:[#allocation2 + $0x170] sm:$0xff] }
 0x483   : > { %v5890_v5 = vpop.permute.xlu1 %3256 }
 0x485   : > { %v3078_v36 = vpop.permute.xlu0 %3077  ;;  %4414 = vmatmul.mubr.msk.f32.gmra.mxu1 %vm389_vm2, %v5810_v15 }
 0x486   : > { %2797 = vmatprep.mubr.f32.mxu1 %v4864_v0  ;;  %v3084_v46 = vsel %vm1016_vm5, %v3078_v36, %v3080_v35 }
 0x487   : > { %v2720_v38 = vpop.permute.xlu1 %2719 }
 0x488   : > { %v2723_v39 = vsel %vm688_vm3, %v2718_v28, %v2720_v38  ;;  %v4007_v28 = vld [vmem:[#allocation2 + $0xf0] sm:$0xff] }
 0x489   : > { %v3076_v32 = vpop.permute.xlu0 %3075  ;;  %4419 = vmatmul.mubr.msk.f32.vlgmr.msra.gmra.mxu1 %vm389_vm2, %v4417_v37  ;;  %4637 = vmatprep.subr.mxu1 %v2723_v39  ;;  %v3987_v38 = vld [vmem:[#allocation2 + $0x50] sm:$0xff] }
 0x48a   : > { %4638 = vmatpush3.msra.mxu1 %v2723_v39  ;;  %2803 = vmatprep.mubr.f32.mxu1 %v4864_v0  ;;  %v3083_v47 = vsel %vm1016_vm5, %v3076_v32, %v3078_v36  ;;  %v4003_v36 = vld [vmem:[#allocation2 + $0xd0] sm:$0xff]  ;;  %v4002_v39 = vld [vmem:[#allocation2 + $0xc8] sm:$0xff]  ;;  %v4021_v32 = vld [vmem:[#allocation2 + $0x160] sm:$0xff] }
 0x48b   : > { %2944 = vmatprep.subr.mxu1 %v2903_v40  ;;  %v2901_v42 = vpop.permute.xlu1 %2900  ;;  %v3986_v40 = vld [vmem:[#allocation2 + $0x48] sm:$0xff] }
 0x48c   : > { %v2904_v43 = vsel %vm852_vm4, %v2899_v31, %v2901_v42  ;;  %v3990_v31 = vld [vmem:[#allocation2 + $0x68] sm:$0xff]  ;;  %v4020_v42 = vld [vmem:[#allocation2 + $0x158] sm:$0xff] }
 0x48d   : > { %v3261_v45 = vpop.permute.xlu0 %3260  ;;  %4420 = vmatmul.mubr.msk.f32.gmra.mxu1 %vm389_vm2, %v4418_v41  ;;  %4642 = vmatprep.subr.mxu0 %v2904_v43 }
 0x48e   : > { %4643 = vmatpush3.msra.mxu0 %v2904_v43  ;;  %4639 = vmatprep.mubr.msk.f32.mxu1 %vm389_vm2, %v4417_v37  ;;  %v4022_v37 = vld [vmem:[#allocation2 + $0x168] sm:$0xff]  ;;  %v3985_v43 = vld [vmem:[#allocation2 + $0x40] sm:$0xff] }
 0x48f   : > { %3125 = vmatprep.subr.mxu0 %v3084_v46  ;;  %v3442_v48 = vpop.permute.xlu1 %3441  ;;  %4645 = vmatmul.mubr.msk.f32.vlgmr.msra.gmra.mxu0 %vm389_vm2, %v4424_v44  ;;  %v3984_v46 = vld [vmem:[#allocation2 + $0x38] sm:$0xff] }
 0x490   : > { %3126 = vmatpush1.msra.mxu0 %v3083_v47  ;;  %3159 = vmatprep.mubr.f32.mxu0 %v4864_v0  ;;  %v3999_v47 = vld [vmem:[#allocation2 + $0xb0] sm:$0xff] }
 0x491   : > { %v3259_v51 = vpop.permute.xlu0 %3258  ;;  %4640 = vmatmul.mubr.msk.f32.vlgmr.msra.gmra.mxu1 %vm389_vm2, %v4418_v41  ;;  %v4001_v41 = vld [vmem:[#allocation2 + $0xc0] sm:$0xff] }
 0x492   : > { %2945 = vmatpush1.msra.mxu1 %v2902_v50  ;;  %2978 = vmatprep.mubr.f32.mxu1 %v4864_v0  ;;  %v3265_v57 = vsel %vm1180_vm6, %v3259_v51, %v3261_v45  ;;  %v3264_v3 = vsel %vm1180_vm6, %v5890_v5, %v3259_v51  ;;  %v3988_v5 = vld [vmem:[#allocation2 + $0x58] sm:$0xff]  ;;  %v3998_v50 = vld [vmem:[#allocation2 + $0xa8] sm:$0xff]  ;;  %v4017_v51 = vld [vmem:[#allocation2 + $0x140] sm:$0xff] }
 0x493   : > { %v3082_v52 = vpop.permute.xlu1 %3081  ;;  %4431 = vmatmul.mubr.msk.f32.vlgmr.msra.gmra.mxu0 %vm389_vm2, %v4429_v49 }
 0x494   : > { %v3085_v53 = vsel %vm1016_vm5, %v3080_v35, %v3082_v52  ;;  %3165 = vmatprep.mubr.f32.mxu0 %v4864_v0  ;;  %v3989_v35 = vld [vmem:[#allocation2 + $0x60] sm:$0xff]  ;;  %v3982_v52 = vld [vmem:[#allocation2 + $0x28] sm:$0xff] }
 0x495   : > { %v3440_v55 = vpop.permute.xlu0 %3439  ;;  %4425 = vmatmul.mubr.msk.f32.vlgmr.msra.gmra.mxu1 %vm389_vm2, %v5828_v12  ;;  %4647 = vmatprep.subr.mxu1 %v3085_v53 }
 0x496   : > { %4648 = vmatpush3.msra.mxu1 %v3085_v53  ;;  %2984 = vmatprep.mubr.f32.mxu1 %v4864_v0  ;;  %v3446_v63 = vsel %vm1344_vm7, %v3440_v55, %v3442_v48  ;;  %v3997_v53 = vld [vmem:[#allocation2 + $0xa0] sm:$0xff] }
 0x497   : > { %3306 = vmatprep.subr.mxu1 %v3265_v57  ;;  %v3263_v58 = vpop.permute.xlu1 %3262  ;;  %4432 = vmatmul.mubr.msk.f32.gmra.mxu0 %vm389_vm2, %v4430_v54  ;;  %v4015_v57 = vld [vmem:[#allocation2 + $0x130] sm:$0xff] }
 0x498   : > { %v3266_v59 = vsel %vm1180_vm6, %v3261_v45, %v3263_v58  ;;  %4654 = vmatprep.mubr.msk.f32.mxu0 %vm389_vm2, %v4435_v56  ;;  %v4019_v45 = vld [vmem:[#allocation2 + $0x150] sm:$0xff]  ;;  %v3980_v58 = vld [vmem:[#allocation2 + $0x18] sm:$0xff] }
 0x499   : > { %v3438_v61 = vpop.permute.xlu0 %3437  ;;  %4426 = vmatmul.mubr.msk.f32.gmra.mxu1 %vm389_vm2, %v4424_v44  ;;  %4652 = vmatprep.subr.mxu0 %v3266_v59  ;;  %v4000_v44 = vld [vmem:[#allocation2 + $0xb8] sm:$0xff] }
 0x49a   : > { %v3445_v62 = vsel %vm1344_vm7, %v3438_v61, %v3440_v55  ;;  %4653 = vmatpush3.msra.mxu0 %v3266_v59  ;;  %4649 = vmatprep.mubr.msk.f32.mxu1 %vm389_vm2, %v4429_v49  ;;  %v3983_v49 = vld [vmem:[#allocation2 + $0x30] sm:$0xff]  ;;  %v3981_v55 = vld [vmem:[#allocation2 + $0x20] sm:$0xff] }
 0x49b   : > { %3487 = vmatprep.subr.mxu0 %v3446_v63  ;;  %v3619_v1 = vpop.permute.xlu1 %3618  ;;  %4655 = vmatmul.mubr.msk.f32.vlgmr.msra.gmra.mxu0 %vm389_vm2, %v4436_v60  ;;  %v3995_v59 = vld [vmem:[#allocation2 + $0x90] sm:$0xff]  ;;  %v4013_v63 = vld [vmem:[#allocation2 + $0x120] sm:$0xff] }
 0x49c   : > { %3488 = vmatpush1.msra.mxu0 %v3445_v62  ;;  %3521 = vmatprep.mubr.f32.mxu0 %v4864_v0  ;;  %v3979_v61 = vld [vmem:[#allocation2 + $0x10] sm:$0xff]  ;;  %v3994_v62 = vld [vmem:[#allocation2 + $0x88] sm:$0xff] }
 0x49d   : > { %v3623_v4 = vpop.permute.xlu0 %3622  ;;  %4650 = vmatmul.mubr.msk.f32.vlgmr.msra.gmra.mxu1 %vm389_vm2, %v4430_v54  ;;  %v4016_v54 = vld [vmem:[#allocation2 + $0x138] sm:$0xff] }
 0x49e   : > { %3307 = vmatpush1.msra.mxu1 %v3264_v3  ;;  %3340 = vmatprep.mubr.f32.mxu1 %v4864_v0  ;;  %v4012_v3 = vld [vmem:[#allocation2 + $0x118] sm:$0xff] }
 0x49f   : > { %v3444_v8 = vpop.permute.xlu1 %3443  ;;  %4443 = vmatmul.mubr.msk.f32.vlgmr.msra.gmra.mxu0 %vm389_vm2, %v4441_v2 }
 0x4a0   : > { %v3447_v9 = vsel %vm1344_vm7, %v3442_v48, %v3444_v8  ;;  %3527 = vmatprep.mubr.f32.mxu0 %v4864_v0  ;;  %v4018_v48 = vld [vmem:[#allocation2 + $0x148] sm:$0xff]  ;;  %v4011_v8 = vld [vmem:[#allocation2 + $0x110] sm:$0xff] }
 0x4a1   : > { %v3621_v10 = vpop.permute.xlu0 %3620  ;;  %4437 = vmatmul.mubr.msk.f32.vlgmr.msra.gmra.mxu1 %vm389_vm2, %v4435_v56  ;;  %4657 = vmatprep.subr.mxu1 %v3447_v9  ;;  %v3996_v56 = vld [vmem:[#allocation2 + $0x98] sm:$0xff] }
 0x4a2   : > { %4658 = vmatpush3.msra.mxu1 %v3447_v9  ;;  %v3627_v13 = vsel %vm1508_vm8, %v3621_v10, %v3623_v4  ;;  %3346 = vmatprep.mubr.f32.mxu1 %v4864_v0  ;;  %v3626_v19 = vsel %vm1508_vm8, %v3619_v1, %v3621_v10  ;;  %v3978_v1 = vld [vmem:[#allocation2 + $0x8] sm:$0xff] }
 0x4a3   : > { %3668 = vmatprep.subr.mxu1 %v3627_v13  ;;  %v3625_v14 = vpop.permute.xlu1 %3624  ;;  %4444 = vmatmul.mubr.msk.f32.gmra.mxu0 %vm389_vm2, %v4442_v34  ;;  %v4010_v9 = vld [vmem:[#allocation2 + $0x108] sm:$0xff] }
 0x4a4   : > { %v3628_v15 = vsel %vm1508_vm8, %v3623_v4, %v3625_v14  ;;  %4664 = vmatprep.mubr.msk.f32.mxu0 %vm389_vm2, %v4447_v11  ;;  %v3977_v4 = vld [vmem:[#allocation2] sm:$0xff]  ;;  %v4026_v10 = vld [vmem:[%s6013_s4 + $0x8] sm:$0xff] }
 0x4a5   : > { %v3802_v12 = vpop.permute.xlu0 %3801  ;;  %4438 = vmatmul.mubr.msk.f32.gmra.mxu1 %vm389_vm2, %v4436_v60  ;;  %4662 = vmatprep.subr.mxu0 %v3628_v15  ;;  %v4014_v60 = vld [vmem:[#allocation2 + $0x128] sm:$0xff] }
 0x4a6   : > { %4663 = vmatpush3.msra.mxu0 %v3628_v15  ;;  %4659 = vmatprep.mubr.msk.f32.mxu1 %vm389_vm2, %v4441_v2  ;;  %v3993_v2 = vld [vmem:[#allocation2 + $0x80] sm:$0xff] }
 0x4a7   : > { %v3804_v18 = vpop.permute.xlu1 %3803  ;;  %4665 = vmatmul.mubr.msk.f32.vlgmr.msra.gmra.mxu0 %vm389_vm2, %v4448_v16  ;;  %4034 = vperm.xlu1 %4785, %v4026_v10  }
 0x4a8   : > { %v3808_v17 = vsel %vm1672_vm9, %v3802_v12, %v3804_v18  ;;  %3883 = vmatprep.mubr.f32.mxu0 %v4864_v0 }
 0x4a9   : > { %v3800_v20 = vpop.permute.xlu0 %3799  ;;  %4660 = vmatmul.mubr.msk.f32.vlgmr.msra.gmra.mxu1 %vm389_vm2, %v4442_v34  ;;  %3849 = vmatprep.subr.mxu0 %v3808_v17  ;;  %v4009_v34 = vld [vmem:[#allocation2 + $0x100] sm:$0xff] }
 0x4aa   : > { %v3807_v22 = vsel %vm1672_vm9, %v3800_v20, %v3802_v12  ;;  %3669 = vmatpush1.msra.mxu1 %v3626_v19  ;;  %3702 = vmatprep.mubr.f32.mxu1 %v4864_v0 }
 0x4ab   : > { %3850 = vmatpush1.msra.mxu0 %v3807_v22  ;;  %v3806_v23 = vpop.permute.xlu1 %3805 }
 0x4ac   : > { %v3809_v24 = vsel %vm1672_vm9, %v3804_v18, %v3806_v23  ;;  %4455 = vmatmul.mubr.msk.f32.vlgmr.msra.gmra.mxu0 %vm389_vm2, %v4453_v21  ;;  %4508 = vmatprep.subr.mxu0 %v4008_v26 }
 0x4ad   : > { %4449 = vmatmul.mubr.msk.f32.vlgmr.msra.gmra.mxu1 %vm389_vm2, %v4447_v11  ;;  %4667 = vmatprep.subr.mxu1 %v3809_v24  ;;  %v5998_v11 = vld [vmem:[#allocation4 + $0x78] sm:$0xff] }
 0x4ae   : > { %4668 = vmatpush3.msra.mxu1 %v3809_v24  ;;  %3708 = vmatprep.mubr.f32.mxu1 %v4864_v0 }
 0x4af   : > { %3889 = vmatprep.mubr.f32.mxu0 %v4864_v0  ;;  %4509 = vmatpush3.msra.mxu0 %v3992_v27  ;;  %v4005_v0 = vld [vmem:[#allocation2 + $0xe0] sm:$0xff] }
 0x4b0   : > { %4456 = vmatmul.mubr.msk.f32.gmra.mxu0 %vm389_vm2, %v4454_v25  ;;  %4510 = vmatprep.subr.mxu0 %v4007_v28 }
 0x4b1   : > { %4450 = vmatmul.mubr.msk.f32.gmra.mxu1 %vm389_vm2, %v4448_v16  ;;  %4511 = vmatpush3.msra.mxu0 %v3991_v29 }
 0x4b2   : > { %4669 = vmatprep.mubr.msk.f32.mxu1 %vm389_vm2, %v4453_v21  ;;  %4512 = vmatprep.subr.mxu0 %v4006_v30 }
 0x4b3   : > { %4513 = vmatpush3.msra.mxu0 %v3990_v31  ;;  %4672 = vmatprep.subr.mxu1 %v4024_v33 }
 0x4b4   : > { %4514 = vmatprep.subr.mxu0 %v4005_v0 }
 0x4b5   : > { %4670 = vmatmul.mubr.msk.f32.vlgmr.msra.gmra.mxu1 %vm389_vm2, %v4454_v25  ;;  %4515 = vmatpush3.msra.mxu0 %v3989_v35 }
 0x4b6   : > { %4673 = vmatpush3.msra.mxu1 %v4024_v33  ;;  %4516 = vmatprep.subr.mxu0 %v4004_v6 }
 0x4b7   : > { %4674 = vmatprep.subr.mxu1 %v4023_v7  ;;  %4517 = vmatpush3.msra.mxu0 %v3988_v5 }
 0x4b8   : > { %4675 = vmatpush3.msra.mxu1 %v4023_v7  ;;  %4518 = vmatprep.subr.mxu0 %v4003_v36 }
 0x4b9   : > { %4676 = vmatprep.subr.mxu1 %v4022_v37  ;;  %4519 = vmatpush3.msra.mxu0 %v3987_v38 }
 0x4ba   : > { %4677 = vmatpush3.msra.mxu1 %v4022_v37  ;;  %4520 = vmatprep.subr.mxu0 %v4002_v39 }
 0x4bb   : > { %4678 = vmatprep.subr.mxu1 %v4021_v32  ;;  %4521 = vmatpush3.msra.mxu0 %v3986_v40 }
 0x4bc   : > { %4679 = vmatpush3.msra.mxu1 %v4021_v32  ;;  %4522 = vmatprep.subr.mxu0 %v4001_v41 }
 0x4bd   : > { %4680 = vmatprep.subr.mxu1 %v4020_v42  ;;  %4523 = vmatpush3.msra.mxu0 %v3985_v43 }
 0x4be   : > { %4681 = vmatpush3.msra.mxu1 %v4020_v42  ;;  %4524 = vmatprep.subr.mxu0 %v4000_v44 }
 0x4bf   : > { %4682 = vmatprep.subr.mxu1 %v4019_v45  ;;  %4525 = vmatpush3.msra.mxu0 %v3984_v46 }
 0x4c0   : > { %4683 = vmatpush3.msra.mxu1 %v4019_v45  ;;  %4526 = vmatprep.subr.mxu0 %v3999_v47 }
 0x4c1   : > { %4684 = vmatprep.subr.mxu1 %v4018_v48  ;;  %4527 = vmatpush3.msra.mxu0 %v3983_v49  ;;  %v4636_v22 = vpop.f32.mrf.mxu0 }
 0x4c2   : > { %4685 = vmatpush3.msra.mxu1 %v4018_v48  ;;  %4528 = vmatprep.subr.mxu0 %v3998_v50 }
 0x4c3   : > { %4686 = vmatprep.subr.mxu1 %v4017_v51  ;;  %4529 = vmatpush3.msra.mxu0 %v3982_v52  ;;  %v2701_v25 = vpop.f32.mrf.mxu0 }
 0x4c4   : > { %4687 = vmatpush3.msra.mxu1 %v4017_v51  ;;  %4530 = vmatprep.subr.mxu0 %v3997_v53 }
 0x4c5   : > { %4688 = vmatprep.subr.mxu1 %v4016_v54  ;;  %4531 = vmatpush3.msra.mxu0 %v3981_v55 }
 0x4c6   : > { %4689 = vmatpush3.msra.mxu1 %v4016_v54  ;;  %4532 = vmatprep.subr.mxu0 %v3996_v56 }
 0x4c7   : > { %4690 = vmatprep.subr.mxu1 %v4015_v57  ;;  %4533 = vmatpush3.msra.mxu0 %v3980_v58 }
 0x4c8   : > { %4691 = vmatpush3.msra.mxu1 %v4015_v57  ;;  %4534 = vmatprep.subr.mxu0 %v3995_v59 }
 0x4c9   : > { %4692 = vmatprep.subr.mxu1 %v4014_v60  ;;  %4535 = vmatpush3.msra.mxu0 %v3979_v61 }
 0x4ca   : > { %4693 = vmatpush3.msra.mxu1 %v4014_v60  ;;  %4536 = vmatprep.subr.mxu0 %v3994_v62 }
 0x4cb   : > { %4694 = vmatprep.subr.mxu1 %v4013_v63  ;;  %4537 = vmatpush3.msra.mxu0 %v3978_v1 }
 0x4cc   : > { %4695 = vmatpush3.msra.mxu1 %v4013_v63  ;;  %4538 = vmatprep.subr.mxu0 %v3993_v2 }
 0x4cd   : > { %4696 = vmatprep.subr.mxu1 %v4012_v3  ;;  %4539 = vmatpush3.msra.mxu0 %v3977_v4 }
 0x4ce   : > { %4697 = vmatpush3.msra.mxu1 %v4012_v3  ;;  %4707 = vmatprep.subr.mxu0 %v5998_v11 }
 0x4cf   : > { %4698 = vmatprep.subr.mxu1 %v4011_v8 }
 0x4d0   : > { %4699 = vmatpush3.msra.mxu1 %v4011_v8 }
 0x4d1   : > { %4700 = vmatprep.subr.mxu1 %v4010_v9 }
 0x4d2   : > { %4701 = vmatpush3.msra.mxu1 %v4010_v9 }
 0x4d3   : > { %4702 = vmatprep.subr.mxu1 %v4009_v34 }
 0x4d4   : > { %4703 = vmatpush3.msra.mxu1 %v4009_v34 }
 0x535   : > { %v2466_v13 = vpop.f32.mrf.mxu1 }
 0x537   : > { %v2468_v14 = vpop.f32.mrf.mxu1 }
 0x539   : > { %v2472_v15 = vpop.f32.mrf.mxu1 }
 0x53b   : > { %v2474_v16 = vpop.f32.mrf.mxu1 }
 0x53d   : > { %v4631_v12 = vpop.f32.mrf.mxu1 }
 0x53e   : > { %v2707_v55 = vadd.f32 %v4636_v22, %v4631_v12 }
 0x53f   : > { %v2543_v18 = vpop.f32.mrf.mxu1 }
 0x540   : > { %v2702_v52 = vadd.f32 %v2701_v25, %v2543_v18 }
 0x541   : > { %v2624_v17 = vpop.f32.mrf.mxu1 }
 0x542   : > { %v2625_v40 = vadd.f32 %v2624_v17, %v2466_v13 }
 0x543   : > { %v2626_v19 = vpop.f32.mrf.mxu1 }
 0x544   : > { %v2627_v43 = vadd.f32 %v2626_v19, %v2468_v14 }
 0x545   : > { %v2630_v20 = vpop.f32.mrf.mxu1 }
 0x546   : > { %v2631_v48 = vadd.f32 %v2630_v20, %v2472_v15 }
 0x547   : > { %v2632_v21 = vpop.f32.mrf.mxu1 }
 0x548   : > { %v2633_v53 = vadd.f32 %v2632_v21, %v2474_v16 }
 0x549   : > { %v2799_v23 = vpop.f32.mrf.mxu1 }
 0x54a   : > { %v2885_v44 = vadd.f32 %v2799_v23, %v2625_v40 }
 0x54b   : > { %v2801_v24 = vpop.f32.mrf.mxu1 }
 0x54c   : > { %v2886_v47 = vadd.f32 %v2801_v24, %v2627_v43 }
 0x54d   : > { %v2805_v26 = vpop.f32.mrf.mxu1 }
 0x54e   : > { %v2888_v56 = vadd.f32 %v2805_v26, %v2631_v48 }
 0x54f   : > { %v2807_v27 = vpop.f32.mrf.mxu1  ;;  %v4646_v28 = vpop.f32.mrf.mxu0 }
 0x550   : > { %v2889_v59 = vadd.f32 %v2807_v27, %v2633_v53  ;;  %v4199_v53 = vld [vmem:[#allocation4 + $0x40] sm:$0xff] }
 0x551   : > { %v4641_v29 = vpop.f32.mrf.mxu1  ;;  %v3057_v30 = vpop.f32.mrf.mxu0 }
 0x552   : > { %v2890_v61 = vadd.f32 %v4641_v29, %v2707_v55  ;;  %v4197_v55 = vld [vmem:[#allocation4 + $0x30] sm:$0xff] }
 0x553   : > { %v2876_v31 = vpop.f32.mrf.mxu1  ;;  %v3161_v0 = vpop.f32.mrf.mxu0 }
 0x554   : > { %v2887_v60 = vadd.f32 %v2876_v31, %v2702_v52  ;;  %v3071_v14 = vadd.f32 %v4646_v28, %v2890_v61  ;;  %v4201_v52 = vld [vmem:[#allocation4 + $0x50] sm:$0xff]  ;;  %v4191_v61 = vld [vmem:[#allocation4] sm:$0xff] }
 0x555   : > { %v2980_v33 = vpop.f32.mrf.mxu1  ;;  %v3163_v35 = vpop.f32.mrf.mxu0 }
 0x556   : > { %v3066_v49 = vadd.f32 %v2980_v33, %v2885_v44  ;;  %v3068_v10 = vadd.f32 %v3057_v30, %v2887_v60  ;;  %v4192_v60 = vld [vmem:[#allocation4 + $0x8] sm:$0xff] }
 0x557   : > { %v2982_v6 = vpop.f32.mrf.mxu1  ;;  %v3167_v7 = vpop.f32.mrf.mxu0 }
 0x558   : > { %v3067_v54 = vadd.f32 %v2982_v6, %v2886_v47  ;;  %v3247_v62 = vadd.f32 %v3161_v0, %v3066_v49  ;;  %v4203_v49 = vld [vmem:[#allocation4 + $0x60] sm:$0xff] }
 0x559   : > { %v2986_v5 = vpop.f32.mrf.mxu1  ;;  %v3169_v36 = vpop.f32.mrf.mxu0 }
 0x55a   : > { %v3069_v63 = vadd.f32 %v2986_v5, %v2888_v56  ;;  %v3248_v3 = vadd.f32 %v3163_v35, %v3067_v54  ;;  %v4198_v54 = vld [vmem:[#allocation4 + $0x38] sm:$0xff]  ;;  %v4196_v56 = vld [vmem:[#allocation4 + $0x28] sm:$0xff] }
 0x55b   : > { %v2988_v37 = vpop.f32.mrf.mxu1  ;;  %v4656_v38 = vpop.f32.mrf.mxu0 }
 0x55c   : > { %v3070_v4 = vadd.f32 %v2988_v37, %v2889_v59  ;;  %v3250_v15 = vadd.f32 %v3167_v7, %v3069_v63  ;;  %v4193_v59 = vld [vmem:[#allocation4 + $0x10] sm:$0xff] }
 0x55d   : > { %v4651_v39 = vpop.f32.mrf.mxu1  ;;  %v3419_v32 = vpop.f32.mrf.mxu0 }
 0x55e   : > { %v3251_v12 = vadd.f32 %v3169_v36, %v3070_v4  ;;  %v3252_v19 = vadd.f32 %v4651_v39, %v3071_v14  ;;  %v4035_v4 = vpop.permute.xlu1 %4034 }
 0x55f   : > { %v3238_v41 = vpop.f32.mrf.mxu1  ;;  %v3523_v42 = vpop.f32.mrf.mxu0 }
 0x560   : > { %v3249_v18 = vadd.f32 %v3238_v41, %v3068_v10  ;;  %v3433_v0 = vadd.f32 %v4656_v38, %v3252_v19  ;;  %v4205_v41 = vld [vmem:[#allocation4 + $0x70] sm:$0xff]  ;;  %v4204_v38 = vld [vmem:[#allocation4 + $0x68] sm:$0xff] }
 0x561   : > { %v3342_v45 = vpop.f32.mrf.mxu1  ;;  %v3525_v46 = vpop.f32.mrf.mxu0 }
 0x562   : > { %v3428_v8 = vadd.f32 %v3342_v45, %v3247_v62  ;;  %v3430_v29 = vadd.f32 %v3419_v32, %v3249_v18 }
 0x563   : > { %v3344_v50 = vpop.f32.mrf.mxu1  ;;  %v3529_v51 = vpop.f32.mrf.mxu0 }
 0x564   : > { %v3429_v13 = vadd.f32 %v3344_v50, %v3248_v3  ;;  %v3609_v20 = vadd.f32 %v3523_v42, %v3428_v8  ;;  %v4030_v3 = vpop.permute.xlu0 %4029 }
 0x565   : > { %v3348_v57 = vpop.f32.mrf.mxu1  ;;  %v3531_v58 = vpop.f32.mrf.mxu0 }
 0x566   : > { %v3431_v21 = vadd.f32 %v3348_v57, %v3250_v15  ;;  %v3610_v23 = vadd.f32 %v3525_v46, %v3429_v13  ;;  %v4195_v57 = vld [vmem:[#allocation4 + $0x20] sm:$0xff] }
 0x567   : > { %v3350_v1 = vpop.f32.mrf.mxu1  ;;  %v4666_v2 = vpop.f32.mrf.mxu0 }
 0x568   : > { %v3432_v24 = vadd.f32 %v3350_v1, %v3251_v12  ;;  %v3612_v30 = vadd.f32 %v3529_v51, %v3431_v21  ;;  %v4202_v51 = vld [vmem:[#allocation4 + $0x58] sm:$0xff] }
 0x569   : > { %v4661_v9 = vpop.f32.mrf.mxu1  ;;  %v3781_v34 = vpop.f32.mrf.mxu0 }
 0x56a   : > { %v3613_v35 = vadd.f32 %v3531_v58, %v3432_v24  ;;  %v3614_v5 = vadd.f32 %v4661_v9, %v3433_v0  ;;  %v4194_v58 = vld [vmem:[#allocation4 + $0x18] sm:$0xff] }
 0x56b   : > { %v3600_v16 = vpop.f32.mrf.mxu1 }
 0x56c   : > { %v3885_v17 = vpop.f32.mrf.mxu0  ;;  %v3611_v6 = vadd.f32 %v3600_v16, %v3430_v29  ;;  %v3795_v45 = vadd.f32 %v4666_v2, %v3614_v5 }
 0x56d   : > { %v3704_v22 = vpop.f32.mrf.mxu1 }
 0x56e   : > { %v3887_v25 = vpop.f32.mrf.mxu0  ;;  %v3790_v26 = vadd.f32 %v3704_v22, %v3609_v20  ;;  %v3792_v44 = vadd.f32 %v3781_v34, %v3611_v6 }
 0x56f   : > { %v3706_v27 = vpop.f32.mrf.mxu1 }
 0x570   : > { %v3791_v31 = vadd.f32 %v3706_v27, %v3610_v23  ;;  %v3891_v28 = vpop.f32.mrf.mxu0  ;;  %v3971_v36 = vadd.f32 %v3885_v17, %v3790_v26 }
 0x571   : > { %v3710_v33 = vpop.f32.mrf.mxu1 }
 0x572   : > { %v3972_v7 = vadd.f32 %v3887_v25, %v3791_v31  ;;  %v3793_v37 = vadd.f32 %v3710_v33, %v3612_v30  ;;  %v3893_v42 = vpop.f32.mrf.mxu0 }
 0x573   : > { %v3712_v39 = vpop.f32.mrf.mxu1 }
 0x574   : > { %v3794_v40 = vadd.f32 %v3712_v39, %v3613_v35  ;;  %4101 = vmatprep.mubr.f32.mxu0 %v3972_v7  ;;  %v3974_v46 = vadd.f32 %v3891_v28, %v3793_v37 }
 0x575   : > { %v4671_v43 = vpop.f32.mrf.mxu1  ;;  %4102 = vmatmul.mubr.f32.vlgmr.msra.gmra.mxu0 %v3971_v36 }
 0x576   : > { %v3975_v32 = vadd.f32 %v3893_v42, %v3794_v40  ;;  %4708 = vmatpush3.msra.mxu0 %v5998_v11  ;;  %v3976_v50 = vadd.f32 %v4671_v43, %v3795_v45  ;;  %v4200_v11 = vld [vmem:[#allocation4 + $0x48] sm:$0xff] }
 0x577   : > { %v3962_v47 = vpop.f32.mrf.mxu1  ;;  %4709 = vmatprep.subr.mxu0 %v4205_v41 }
 0x578   : > { %v3973_v48 = vadd.f32 %v3962_v47, %v3792_v44  ;;  %4106 = vmatprep.mubr.f32.mxu0 %v3975_v32  ;;  %4710 = vmatpush3.msra.mxu0 %v4205_v41 }
 0x579   : > { %4107 = vmatmul.mubr.f32.gmra.mxu0 %v3974_v46  ;;  %4711 = vmatprep.subr.mxu0 %v4204_v38 }
 0x57a   : > { %4704 = vmatprep.mubr.f32.mxu1 %v3973_v48  ;;  %4712 = vmatpush3.msra.mxu0 %v4204_v38 }
 0x57b   : > { %4705 = vmatmul.mubr.f32.vlgmr.msra.gmra.mxu1 %v3976_v50  ;;  %4713 = vmatprep.subr.mxu0 %v4203_v49 }
 0x57c   : > { %4714 = vmatpush3.msra.mxu0 %v4203_v49 }
 0x57d   : > { %4715 = vmatprep.subr.mxu0 %v4202_v51 }
 0x57e   : > { %4716 = vmatpush3.msra.mxu0 %v4202_v51 }
 0x57f   : > { %4717 = vmatprep.subr.mxu0 %v4201_v52 }
 0x580   : > { %4718 = vmatpush3.msra.mxu0 %v4201_v52 }
 0x581   : > { %4719 = vmatprep.subr.mxu0 %v4200_v11 }
 0x582   : > { %4720 = vmatpush3.msra.mxu0 %v4200_v11 }
 0x583   : > { %4721 = vmatprep.subr.mxu0 %v4199_v53 }
 0x584   : > { %4722 = vmatpush3.msra.mxu0 %v4199_v53 }
 0x585   : > { %4723 = vmatprep.subr.mxu0 %v4198_v54 }
 0x586   : > { %4724 = vmatpush3.msra.mxu0 %v4198_v54 }
 0x587   : > { %4725 = vmatprep.subr.mxu0 %v4197_v55 }
 0x588   : > { %4726 = vmatpush3.msra.mxu0 %v4197_v55 }
 0x589   : > { %4727 = vmatprep.subr.mxu0 %v4196_v56 }
 0x58a   : > { %4728 = vmatpush3.msra.mxu0 %v4196_v56 }
 0x58b   : > { %4729 = vmatprep.subr.mxu0 %v4195_v57 }
 0x58c   : > { %4730 = vmatpush3.msra.mxu0 %v4195_v57 }
 0x58d   : > { %4731 = vmatprep.subr.mxu0 %v4194_v58 }
 0x58e   : > { %4732 = vmatpush3.msra.mxu0 %v4194_v58 }
 0x58f   : > { %4733 = vmatprep.subr.mxu0 %v4193_v59 }
 0x590   : > { %4734 = vmatpush3.msra.mxu0 %v4193_v59 }
 0x591   : > { %4735 = vmatprep.subr.mxu0 %v4192_v60 }
 0x592   : > { %4736 = vmatpush3.msra.mxu0 %v4192_v60 }
 0x593   : > { %4737 = vmatprep.subr.mxu0 %v4191_v61 }
 0x594   : > { %4738 = vmatpush3.msra.mxu0 %v4191_v61 }
 0x635   : > { %v4540_v62 = vpop.f32.mrf.mxu0 }
 0x637   : > { %v4541_v63 = vpop.f32.mrf.mxu0 }
 0x638   : > { %v4542_v1 = vadd.f32 %v4541_v63, %v4540_v62 }
 0x639   : > { %v4543_v2 = vpop.f32.mrf.mxu0 }
 0x63a   : > { %v4104_v10 = vadd.f32 %v4542_v1, %v4030_v3 }
 0x63b   : > { %v4544_v8 = vpop.f32.mrf.mxu0  ;;  %v4706_v9 = vpop.f32.mrf.mxu1 }
 0x63c   : > { %v4545_v34 = vadd.f32 %v4544_v8, %v4543_v2 }
 0x63d   : > { %v4178_v13 = vpop.f32.mrf.mxu1 }
 0x63e   : > { %v4179_v14 = vadd.f32 %v4178_v13, %v4104_v10  ;;  %v4109_v15 = vadd.f32 %v4545_v34, %v4035_v4 }
 0x640   : > { %v4187_v16 = vmax.f32 %v4179_v14, 0.0  ;;  %v4184_v12 = vadd.f32 %v4706_v9, %v4109_v15 }
 0x642   : > { %v4189_v18 = vmul.f32 %v4187_v16, %v4187_v16  ;;  %v4188_v17 = vmax.f32 %v4184_v12, 0.0 }
 0x644   : > { %v4190_v19 = vmul.f32 %v4188_v17, %v4188_v17  ;;  %4739 = vmatprep.mubr.f32.mxu0 %v4189_v18 }
 0x646   : > { %4740 = vmatmul.mubr.f32.vlgmr.msra.gmra.mxu0 %v4190_v19 }
 0x706   : > { %v4741_v20 = vpop.f32.mrf.mxu0 }
 0x707   : > { %v4283_v21 = vmax.f32 %v4741_v20, 1e-24 }
 0x708   : > { %v4273_v22 = vpop.f32.mrf.mxu0 }
 0x709   : > { %4788 = vrsqrt.f32 %v4283_v21  ;;  %v4282_v23 = vmax.f32 %v4273_v22, 1e-24 }
 0x70b   : > { %4790 = vrsqrt.f32 %v4282_v23 }
 0x716   : > { %v4789_v24 = vpop.eup %4788 }
 0x717   : > { %v4287_v25 = vmul.f32 %v4789_v24, %v4188_v17 }
 0x718   : > { %v4791_v26 = vpop.eup %4790 }
 0x719   : > { %4290 = vst.msk [vmem:[%s362_s29 + $0x8] sm:$0xff] %vm4288_vm10, %v4287_v25  ;;  %v4286_v27 = vmul.f32 %v4791_v26, %v4187_v16 }
 0x71b   : > { %4289 = vst.msk [vmem:[%s362_s29] sm:$0xff] %vm4288_vm10, %v4286_v27 }
 0x71c PF: > { %s21_s30 = sadd.s32 1, %s4858_s30  }
 0x71d   : > { %p18_p2 = scmp.ge.s32.totalorder %s21_s30, 4  }
 0x71f   :  { %20 = sbr.rel (!%p18_p2) target bundleno = 2 (0x2), region = 111 }
 0x724   :  { %4312 = vsyncpa [#allocation3], 1 }
 0x725   :  { %4314 = vsyncpa [#allocation3 + $0x1], 1 }
 0x726   :  { %4315 = vsyncpa [#allocation5], 1 }

</bundles_post_ra>
